<compile_context>
chip_gen: v7x
topology: tpu7x:2x2x1
jax: 0.10.0
libtpu: 0.0.40
codegen_flags: <defaults>
</compile_context>

<pallas_src>
import math
from functools import partial

import jax
import jax.numpy as jnp
import numpy as np
from jax.experimental import pallas as pl
from jax.experimental.pallas import tpu as pltpu


# ----------------------------- Pallas kernels ------------------------------

def _pool_gate_kernel(x_ref, time_ref, fc1t_ref, fc2t_ref, fc2b_ref,
                      dynw_ref, dynb_ref, eca_ref, finw_ref, finb_ref,
                      gate_ref, acc_ref, *,
                      dilations, k_size, temperature, n_ch, n_sp, tile_s):
    """Fused AdaptiveAvgPool3d(1) + gate computation.

    Grid is (B, nT); the spatial reduction accumulates into a lane-padded
    (1, Cpad) f32 scratch, and the tiny gate math runs once per batch in the
    epilogue of the last spatial tile.
    """
    t = pl.program_id(1)
    C = n_ch
    Cpad = acc_ref.shape[1]

    @pl.when(t == 0)
    def _init():
        acc_ref[...] = jnp.zeros_like(acc_ref)

    # ---- streaming partial sum over the spatial lanes (native dtype input)
    xt = x_ref[...].astype(jnp.float32)                        # (1, C, TS)
    if n_sp % tile_s != 0:                                     # ragged tail
        lane3 = jax.lax.broadcasted_iota(jnp.int32, xt.shape, 2)
        xt = jnp.where(t * tile_s + lane3 < n_sp, xt, 0.0)
    acc_ref[:, :C] = acc_ref[:, :C] + jnp.sum(xt, axis=-1)     # (1, C)

    # ---- epilogue: compute the per-batch gate once, at the last tile
    @pl.when(t == pl.num_programs(1) - 1)
    def _gate():
        y = acc_ref[...] * (1.0 / float(n_sp))                 # (1, Cpad)
        lane = jax.lax.broadcasted_iota(jnp.int32, (1, Cpad), 1)
        valid = lane < C

        cache = {}

        def shifted(s):
            # shifted(s)[0, c] == y[0, c + s]  (zero outside the valid range)
            if s not in cache:
                if s == 0:
                    cache[s] = y
                else:
                    rolled = pltpu.roll(y, shift=(-s) % Cpad, axis=1)
                    ok = jnp.logical_and(lane + s >= 0, lane + s < C)
                    cache[s] = jnp.where(ok, rolled, 0.0)
            return cache[s]

        # --- ECA branch: Conv1d(1, 1, k_size, padding=(k_size-1)//2, no bias)
        pad = (k_size - 1) // 2
        y_eca = jnp.zeros_like(y)
        for j in range(k_size):
            y_eca = y_eca + eca_ref[j] * shifted(j - pad)
        feats = [y_eca]

        # --- dynamic ASPP branches (Dynamic_conv1d_refer per dilation rate)
        tm = time_ref[0]                                       # (1, T)
        for r, d in enumerate(dilations):
            # attention1d(time): 1x1 conv -> relu -> 1x1 conv -> softmax(./T)
            h = jnp.maximum(
                jnp.dot(tm, fc1t_ref[r], preferred_element_type=jnp.float32),
                0.0)                                           # (1, Hh)
            logits = jnp.dot(h, fc2t_ref[r],
                             preferred_element_type=jnp.float32)   # (1, K)
            logits = (logits + fc2b_ref[r][None, :]) * (1.0 / temperature)
            logits = logits - jnp.max(logits, axis=1, keepdims=True)
            e = jnp.exp(logits)
            attn = e / jnp.sum(e, axis=1, keepdims=True)       # (1, K)

            aw = jnp.dot(attn, dynw_ref[r],
                         preferred_element_type=jnp.float32)   # (1, 3)
            ab = jnp.dot(attn, dynb_ref[r],
                         preferred_element_type=jnp.float32)   # (1, 1)

            # per-batch grouped conv1d, kernel 3, dilation d, "same" padding
            yd = (ab
                  + aw[:, 0:1] * shifted(-d)
                  + aw[:, 1:2] * shifted(0)
                  + aw[:, 2:3] * shifted(d))
            feats.append(yd)

        # --- final_conv: InstanceNorm1d(M, affine=False, eps=1e-5) + Conv1d(M,1,1)
        inv_c = 1.0 / float(C)
        out = jnp.zeros_like(y) + finb_ref[0]
        for m, f in enumerate(feats):
            mu = jnp.sum(jnp.where(valid, f, 0.0),
                         axis=1, keepdims=True) * inv_c
            diff = f - mu
            var = jnp.sum(jnp.where(valid, diff * diff, 0.0),
                          axis=1, keepdims=True) * inv_c
            out = out + finw_ref[m] * (diff * jax.lax.rsqrt(var + 1e-5))

        # numerically stable sigmoid via tanh (EUP)
        gate = 0.5 * (jnp.tanh(0.5 * out) + 1.0)
        gate_ref[...] = gate.reshape(gate_ref.shape)


def _mod_kernel(x_ref, g_ref, o_ref):
    """result = x + x * gate  (gate broadcast over the spatial lanes)."""
    xv = x_ref[...].astype(jnp.float32)
    o_ref[...] = (xv * (1.0 + g_ref[...])).astype(o_ref.dtype)


# ------------------------------- wrapper ------------------------------------

def _pick_spatial_tile(s, c, itemsize, target_bytes):
    """Largest 128-multiple lane tile with block size ~target_bytes."""
    if s <= 128:
        return int(s)
    ts = (target_bytes // max(1, c * itemsize)) // 128 * 128
    ts = max(128, ts)
    return int(min(s, ts))


def eca_dyn_time_forward(x, time_emb, params, *, dilate_rate, k_size=3,
                         temperature=34.0,
                         block_bytes=2 * 1024 * 1024,
                         vmem_limit_bytes=32 * 1024 * 1024):
    B, C, D, H, W = x.shape
    S = D * H * W
    x_flat = x.reshape(B, C, S)                      # native dtype, no copy

    itemsize = jnp.dtype(x.dtype).itemsize
    TS = _pick_spatial_tile(S, C, itemsize, block_bytes)
    nT = (S + TS - 1) // TS                          # ragged tail handled
    Cpad = ((C + 127) // 128) * 128                  # lane-padded gate width

    time3 = time_emb.astype(jnp.float32).reshape(B, 1, -1)
    Tdim = time3.shape[-1]
    fc1t = jnp.transpose(params["fc1_w"], (0, 2, 1))   # (R, T, Hh)
    fc2t = jnp.transpose(params["fc2_w"], (0, 2, 1))   # (R, Hh, K)

    def _full(a):
        return pl.BlockSpec(a.shape, lambda b, t, n=a.ndim: (0,) * n)

    smem = pl.BlockSpec(memory_space=pltpu.MemorySpace.SMEM)

    # ---- kernel 1: fused global average pool + gate (one gate row per batch)
    # NOTE: on v7x (2 TCs) with B == 1 only the batch axis is parallel here;
    # the modulate kernel below still parallelizes over spatial tiles.
    gate_pad = pl.pallas_call(
        partial(_pool_gate_kernel, dilations=tuple(int(d) for d in dilate_rate),
                k_size=int(k_size), temperature=float(temperature),
                n_ch=C, n_sp=S, tile_s=TS),
        out_shape=jax.ShapeDtypeStruct((B, 1, Cpad), jnp.float32),
        grid=(B, nT),
        in_specs=[pl.BlockSpec((1, C, TS), lambda b, t: (b, 0, t)),
                  pl.BlockSpec((1, 1, Tdim), lambda b, t: (b, 0, 0)),
                  _full(fc1t), _full(fc2t), _full(params["fc2_b"]),
                  _full(params["dyn_w"]), _full(params["dyn_b"]),
                  smem, smem, smem],
        out_specs=pl.BlockSpec((1, 1, Cpad), lambda b, t: (b, 0, 0)),
        scratch_shapes=[pltpu.VMEM((1, Cpad), jnp.float32)],
        compiler_params=pltpu.CompilerParams(
            dimension_semantics=("parallel", "arbitrary"),
            vmem_limit_bytes=vmem_limit_bytes),
    )(x_flat, time3, fc1t, fc2t, params["fc2_b"], params["dyn_w"],
      params["dyn_b"], params["eca_w"], params["fin_w"], params["fin_b"])

    gate = gate_pad[:, 0, :C].reshape(B, C, 1)       # tiny XLA slice/reshape

    # ---- kernel 2: broadcast + modulate:  result = x + x * sigmoid(gate)
    out_flat = pl.pallas_call(
        _mod_kernel,
        out_shape=jax.ShapeDtypeStruct((B, C, S), x.dtype),
        grid=(B, nT),
        in_specs=[pl.BlockSpec((1, C, TS), lambda b, t: (b, 0, t)),
                  pl.BlockSpec((1, C, 1), lambda b, t: (b, 0, 0))],
        out_specs=pl.BlockSpec((1, C, TS), lambda b, t: (b, 0, t)),
        compiler_params=pltpu.CompilerParams(
            dimension_semantics=("parallel", "parallel"),
            vmem_limit_bytes=vmem_limit_bytes),
    )(x_flat, gate)

    return out_flat.reshape(B, C, D, H, W)


# --------------------------- parameter creation -----------------------------

def init_params(key, *, time_dim, k_size, dilate_rate, dyn_K, ratio=0.25):
    R = len(dilate_rate)
    M = 1 + R
    Hh = dyn_K if time_dim == 3 else int(time_dim * ratio) + 1
    ks = jax.random.split(key, 8)
    return {
        # eca_conv: Conv1d(1, 1, k_size, bias=False) -> (k_size,)
        "eca_w": jax.random.normal(ks[0], (k_size,), jnp.float32) * 0.5,
        # attention1d per dilation rate
        "fc1_w": jax.random.normal(ks[1], (R, Hh, time_dim), jnp.float32)
                 / math.sqrt(time_dim),
        "fc2_w": jax.random.normal(ks[2], (R, dyn_K, Hh), jnp.float32)
                 / math.sqrt(Hh),
        "fc2_b": jax.random.normal(ks[3], (R, dyn_K), jnp.float32) * 0.1,
        # dynamic conv expert kernels (K, out=1, in=1, ks=3) -> (K, 3) and bias
        "dyn_w": jax.random.normal(ks[4], (R, dyn_K, 3), jnp.float32) * 0.5,
        "dyn_b": jax.random.normal(ks[5], (R, dyn_K, 1), jnp.float32) * 0.1,
        # final_conv: Conv1d(M, 1, 1) weight / bias
        "fin_w": jax.random.normal(ks[6], (M,), jnp.float32) * 0.5,
        "fin_b": jax.random.normal(ks[7], (1,), jnp.float32) * 0.1,
    }


# --------------------------- pure-JAX reference ------------------------------

def reference_forward(x, time_emb, params, *, dilate_rate, k_size=3,
                      temperature=34.0):
    x = x.astype(jnp.float32)
    B, C = x.shape[0], x.shape[1]
    y = jnp.mean(x.reshape(B, C, -1), axis=-1)                      # (B, C)

    pad = (k_size - 1) // 2
    ypad = jnp.pad(y, ((0, 0), (pad, pad)))
    y_eca = sum(params["eca_w"][j] * ypad[:, j:j + C] for j in range(k_size))

    feats = [y_eca]
    for r, d in enumerate(dilate_rate):
        h = jax.nn.relu(time_emb @ params["fc1_w"][r].T)
        logits = h @ params["fc2_w"][r].T + params["fc2_b"][r]
        attn = jax.nn.softmax(logits / temperature, axis=1)
        aw = attn @ params["dyn_w"][r]                               # (B, 3)
        ab = attn @ params["dyn_b"][r]                               # (B, 1)
        ypd = jnp.pad(y, ((0, 0), (d, d)))
        yd = sum(aw[:, j:j + 1] * ypd[:, j * d:j * d + C] for j in range(3)) + ab
        feats.append(yd)

    f = jnp.stack(feats, axis=1)                                     # (B, M, C)
    mu = jnp.mean(f, axis=-1, keepdims=True)
    var = jnp.mean((f - mu) ** 2, axis=-1, keepdims=True)
    fn = (f - mu) / jnp.sqrt(var + 1e-5)
    pre = jnp.einsum("bmc,m->bc", fn, params["fin_w"]) + params["fin_b"][0]
    gate = jax.nn.sigmoid(pre).reshape(B, C, 1, 1, 1)
    return x + x * gate


# ---------------------------------- main -------------------------------------

if __name__ == "__main__":
    B, C = 2, 8
    D = H = W = 16
    time_dim = 32
    dilate_rate = (1, 2, 3)
    dyn_K = 4
    k_size = 3
    temperature = 34.0

    key = jax.random.PRNGKey(0)
    kx, kt, kp = jax.random.split(key, 3)
    x = jax.random.normal(kx, (B, C, D, H, W), jnp.float32)
    time_emb = jax.random.normal(kt, (B, time_dim), jnp.float32)
    params = init_params(kp, time_dim=time_dim, k_size=k_size,
                         dilate_rate=dilate_rate, dyn_K=dyn_K)

    out = eca_dyn_time_forward(x, time_emb, params, dilate_rate=dilate_rate,
                               k_size=k_size, temperature=temperature)
    out = jax.block_until_ready(out)

    ref = jax.block_until_ready(
        reference_forward(x, time_emb, params, dilate_rate=dilate_rate,
                          k_size=k_size, temperature=temperature))

    np.testing.assert_allclose(np.asarray(out, dtype=np.float32),
                               np.asarray(ref), rtol=5e-2, atol=1e-3)
    print("KERNEL_OK")
</pallas_src>

<mosaic_0001>
module attributes {stable_mosaic.version = 11 : i64} {
  func.func @_pool_gate_kernel(%arg0: i32, %arg1: i32, %arg2: memref<1x8x4096xf32, #tpu.memory_space<vmem>>, %arg3: memref<1x1x32xf32, #tpu.memory_space<vmem>>, %arg4: memref<3x32x9xf32, #tpu.memory_space<vmem>>, %arg5: memref<3x9x4xf32, #tpu.memory_space<vmem>>, %arg6: memref<3x4xf32, #tpu.memory_space<vmem>>, %arg7: memref<3x4x3xf32, #tpu.memory_space<vmem>>, %arg8: memref<3x4x1xf32, #tpu.memory_space<vmem>>, %arg9: memref<3xf32, #tpu.memory_space<smem>>, %arg10: memref<4xf32, #tpu.memory_space<smem>>, %arg11: memref<1xf32, #tpu.memory_space<smem>>, %arg12: memref<1x1x128xf32, #tpu.memory_space<vmem>>, %arg13: memref<1x128xf32, #tpu.memory_space<vmem>>) attributes {dimension_semantics = [#tpu.dimension_semantics<parallel>, #tpu.dimension_semantics<arbitrary>], iteration_bounds = array<i64: 2, 1>, scalar_prefetch = 0 : i64, scratch_operands = 1 : i64, tpu.core_type = #tpu.core_type<tc>, window_params = [{transform_indices = @transform_0, window_bounds = array<i64: 1, 8, 4096>}, {transform_indices = @transform_1, window_bounds = array<i64: 1, 1, 32>}, {pipeline_mode = #tpu.pipeline_mode<synchronous>, transform_indices = @transform_2, window_bounds = array<i64: 3, 32, 9>}, {pipeline_mode = #tpu.pipeline_mode<synchronous>, transform_indices = @transform_3, window_bounds = array<i64: 3, 9, 4>}, {pipeline_mode = #tpu.pipeline_mode<synchronous>, transform_indices = @transform_4, window_bounds = array<i64: 3, 4>}, {pipeline_mode = #tpu.pipeline_mode<synchronous>, transform_indices = @transform_5, window_bounds = array<i64: 3, 4, 3>}, {pipeline_mode = #tpu.pipeline_mode<synchronous>, transform_indices = @transform_6, window_bounds = array<i64: 3, 4, 1>}, {transform_indices = @transform_7, window_bounds = array<i64: 3>}, {transform_indices = @transform_8, window_bounds = array<i64: 4>}, {transform_indices = @transform_9, window_bounds = array<i64: 1>}, {transform_indices = @transform_10, window_bounds = array<i64: 1, 1, 128>}]} {
    %c0_i32 = arith.constant 0 : i32
    %0 = arith.cmpi eq, %arg1, %c0_i32 : i32
    %1 = arith.extui %0 : i1 to i32
    %c0_i32_0 = arith.constant 0 : i32
    %2 = arith.cmpi ne, %1, %c0_i32_0 : i32
    scf.if %2 {
      %cst_9 = arith.constant 0.000000e+00 : f32
      %11 = vector.broadcast %cst_9 : f32 to vector<1x128xf32>
      %c0_10 = arith.constant 0 : index
      %c0_11 = arith.constant 0 : index
      %12 = vector.load %arg13[%c0_10, %c0_11] : memref<1x128xf32, #tpu.memory_space<vmem>>, vector<1x128xf32>
      tpu.vector_store %arg13[%c0_10, %c0_11], %11 {strides = array<i32>} : memref<1x128xf32, #tpu.memory_space<vmem>>, vector<1x128xf32>,
    } else {
    }
    %c0 = arith.constant 0 : index
    %c0_1 = arith.constant 0 : index
    %c0_2 = arith.constant 0 : index
    %3 = vector.load %arg2[%c0, %c0_1, %c0_2] : memref<1x8x4096xf32, #tpu.memory_space<vmem>>, vector<1x8x4096xf32>
    %c0_3 = arith.constant 0 : index
    %c0_4 = arith.constant 0 : index
    %4 = vector.load %arg13[%c0_3, %c0_4] : memref<1x128xf32, #tpu.memory_space<vmem>>, vector<1x8xf32>
    %cst = arith.constant dense<0.000000e+00> : vector<1x8xf32>
    %5 = vector.multi_reduction <add>, %3, %cst [2] : vector<1x8x4096xf32> to vector<1x8xf32>
    %6 = arith.addf %4, %5 : vector<1x8xf32>
    %c0_5 = arith.constant 0 : index
    %c0_6 = arith.constant 0 : index
    %7 = vector.load %arg13[%c0_5, %c0_6] : memref<1x128xf32, #tpu.memory_space<vmem>>, vector<1x8xf32>
    tpu.vector_store %arg13[%c0_5, %c0_6], %6 {strides = array<i32>} : memref<1x128xf32, #tpu.memory_space<vmem>>, vector<1x8xf32>,
    %c0_i32_7 = arith.constant 0 : i32
    %8 = arith.cmpi eq, %arg1, %c0_i32_7 : i32
    %9 = arith.extui %8 : i1 to i32
    %c0_i32_8 = arith.constant 0 : i32
    %10 = arith.cmpi ne, %9, %c0_i32_8 : i32
    scf.if %10 {
      %c0_9 = arith.constant 0 : index
      %c0_10 = arith.constant 0 : index
      %11 = vector.load %arg13[%c0_9, %c0_10] : memref<1x128xf32, #tpu.memory_space<vmem>>, vector<1x128xf32>
      %cst_11 = arith.constant 2.44140625E-4 : f32
      %12 = vector.broadcast %cst_11 : f32 to vector<1x128xf32>
      %13 = arith.mulf %11, %12 : vector<1x128xf32>
      %14 = tpu.iota {dimensions = array<i32: 1>} : vector<1x128xi32>
      %c8_i32 = arith.constant 8 : i32
      %15 = vector.broadcast %c8_i32 : i32 to vector<1x128xi32>
      %16 = arith.cmpi slt, %14, %15 : vector<1x128xi32>
      %cst_12 = arith.constant 0.000000e+00 : f32
      %17 = vector.broadcast %cst_12 : f32 to vector<1x128xf32>
      %c0_13 = arith.constant 0 : index
      %18 = memref.load %arg9[%c0_13] : memref<3xf32, #tpu.memory_space<smem>>
      %c1_i32 = arith.constant 1 : i32
      %19 = tpu.dynamic_rotate %13 by %c1_i32 dim 1 : vector<1x128xf32>, i32 -> vector<1x128xf32>
      %c-1_i32 = arith.constant -1 : i32
      %20 = vector.broadcast %c-1_i32 : i32 to vector<1x128xi32>
      %21 = arith.addi %14, %20 : vector<1x128xi32>
      %c0_i32_14 = arith.constant 0 : i32
      %22 = vector.broadcast %c0_i32_14 : i32 to vector<1x128xi32>
      %23 = arith.cmpi sge, %21, %22 : vector<1x128xi32>
      %c-1_i32_15 = arith.constant -1 : i32
      %24 = vector.broadcast %c-1_i32_15 : i32 to vector<1x128xi32>
      %25 = arith.addi %14, %24 : vector<1x128xi32>
      %c8_i32_16 = arith.constant 8 : i32
      %26 = vector.broadcast %c8_i32_16 : i32 to vector<1x128xi32>
      %27 = arith.cmpi slt, %25, %26 : vector<1x128xi32>
      %28 = arith.andi %23, %27 : vector<1x128xi1>
      %cst_17 = arith.constant 0.000000e+00 : f32
      %29 = vector.broadcast %cst_17 : f32 to vector<1x128xf32>
      %30 = arith.select %28, %19, %29 : vector<1x128xi1>, vector<1x128xf32>
      %31 = vector.broadcast %18 : f32 to vector<1x128xf32>
      %32 = arith.mulf %31, %30 : vector<1x128xf32>
      %33 = arith.addf %17, %32 : vector<1x128xf32>
      %c1 = arith.constant 1 : index
      %34 = memref.load %arg9[%c1] : memref<3xf32, #tpu.memory_space<smem>>
      %35 = vector.broadcast %34 : f32 to vector<1x128xf32>
      %36 = arith.mulf %35, %13 : vector<1x128xf32>
      %37 = arith.addf %33, %36 : vector<1x128xf32>
      %c2 = arith.constant 2 : index
      %38 = memref.load %arg9[%c2] : memref<3xf32, #tpu.memory_space<smem>>
      %c127_i32 = arith.constant 127 : i32
      %39 = tpu.dynamic_rotate %13 by %c127_i32 dim 1 : vector<1x128xf32>, i32 -> vector<1x128xf32>
      %c1_i32_18 = arith.constant 1 : i32
      %40 = vector.broadcast %c1_i32_18 : i32 to vector<1x128xi32>
      %41 = arith.addi %14, %40 : vector<1x128xi32>
      %c0_i32_19 = arith.constant 0 : i32
      %42 = vector.broadcast %c0_i32_19 : i32 to vector<1x128xi32>
      %43 = arith.cmpi sge, %41, %42 : vector<1x128xi32>
      %c1_i32_20 = arith.constant 1 : i32
      %44 = vector.broadcast %c1_i32_20 : i32 to vector<1x128xi32>
      %45 = arith.addi %14, %44 : vector<1x128xi32>
      %c8_i32_21 = arith.constant 8 : i32
      %46 = vector.broadcast %c8_i32_21 : i32 to vector<1x128xi32>
      %47 = arith.cmpi slt, %45, %46 : vector<1x128xi32>
      %48 = arith.andi %43, %47 : vector<1x128xi1>
      %cst_22 = arith.constant 0.000000e+00 : f32
      %49 = vector.broadcast %cst_22 : f32 to vector<1x128xf32>
      %50 = arith.select %48, %39, %49 : vector<1x128xi1>, vector<1x128xf32>
      %51 = vector.broadcast %38 : f32 to vector<1x128xf32>
      %52 = arith.mulf %51, %50 : vector<1x128xf32>
      %53 = arith.addf %37, %52 : vector<1x128xf32>
      %c0_23 = arith.constant 0 : index
      %c0_24 = arith.constant 0 : index
      %c0_25 = arith.constant 0 : index
      %54 = vector.load %arg3[%c0_23, %c0_24, %c0_25] : memref<1x1x32xf32, #tpu.memory_space<vmem>>, vector<1x1x32xf32>
      %55 = vector.shape_cast %54 : vector<1x1x32xf32> to vector<1x32xf32>
      %c0_26 = arith.constant 0 : index
      %c0_27 = arith.constant 0 : index
      %c0_28 = arith.constant 0 : index
      %56 = vector.load %arg4[%c0_26, %c0_27, %c0_28] : memref<3x32x9xf32, #tpu.memory_space<vmem>>, vector<1x32x9xf32>
      %57 = vector.shape_cast %56 : vector<1x32x9xf32> to vector<32x9xf32>
      %cst_29 = arith.constant dense<0.000000e+00> : vector<1x9xf32>
      %58 = tpu.matmul %55, %57, %cst_29 {dimension_numbers = #tpu.dot_dimension_numbers<[1], [0], [0], [1], [0, 0, 1, 1], [], []>} : vector<1x32xf32>, vector<32x9xf32>, vector<1x9xf32> -> vector<1x9xf32>
      %cst_30 = arith.constant 0.000000e+00 : f32
      %59 = vector.broadcast %cst_30 : f32 to vector<1x9xf32>
      %60 = arith.maximumf %58, %59 : vector<1x9xf32>
      %c0_31 = arith.constant 0 : index
      %c0_32 = arith.constant 0 : index
      %c0_33 = arith.constant 0 : index
      %61 = vector.load %arg5[%c0_31, %c0_32, %c0_33] : memref<3x9x4xf32, #tpu.memory_space<vmem>>, vector<1x9x4xf32>
      %62 = vector.shape_cast %61 : vector<1x9x4xf32> to vector<9x4xf32>
      %cst_34 = arith.constant dense<0.000000e+00> : vector<1x4xf32>
      %63 = tpu.matmul %60, %62, %cst_34 {dimension_numbers = #tpu.dot_dimension_numbers<[1], [0], [0], [1], [0, 0, 1, 1], [], []>} : vector<1x9xf32>, vector<9x4xf32>, vector<1x4xf32> -> vector<1x4xf32>
      %c0_35 = arith.constant 0 : index
      %c0_36 = arith.constant 0 : index
      %64 = vector.load %arg6[%c0_35, %c0_36] : memref<3x4xf32, #tpu.memory_space<vmem>>, vector<1x4xf32>
      %65 = vector.shape_cast %64 : vector<1x4xf32> to vector<4xf32>
      %66 = vector.shape_cast %65 : vector<4xf32> to vector<1x4xf32>
      %67 = arith.addf %63, %66 : vector<1x4xf32>
      %cst_37 = arith.constant 0.0294117648 : f32
      %68 = vector.broadcast %cst_37 : f32 to vector<1x4xf32>
      %69 = arith.mulf %67, %68 : vector<1x4xf32>
      %cst_38 = arith.constant dense<0xFF800000> : vector<1xf32>
      %70 = vector.multi_reduction <maximumf>, %69, %cst_38 [1] : vector<1x4xf32> to vector<1xf32>
      %71 = vector.shape_cast %70 : vector<1xf32> to vector<1x1xf32>
      %72 = vector.broadcast %71 : vector<1x1xf32> to vector<1x4xf32>
      %73 = arith.subf %69, %72 : vector<1x4xf32>
      %74 = math.exp %73 : vector<1x4xf32>
      %cst_39 = arith.constant dense<0.000000e+00> : vector<1xf32>
      %75 = vector.multi_reduction <add>, %74, %cst_39 [1] : vector<1x4xf32> to vector<1xf32>
      %76 = vector.shape_cast %75 : vector<1xf32> to vector<1x1xf32>
      %77 = vector.broadcast %76 : vector<1x1xf32> to vector<1x4xf32>
      %78 = arith.divf %74, %77 : vector<1x4xf32>
      %c0_40 = arith.constant 0 : index
      %c0_41 = arith.constant 0 : index
      %c0_42 = arith.constant 0 : index
      %79 = vector.load %arg7[%c0_40, %c0_41, %c0_42] : memref<3x4x3xf32, #tpu.memory_space<vmem>>, vector<1x4x3xf32>
      %80 = vector.shape_cast %79 : vector<1x4x3xf32> to vector<4x3xf32>
      %cst_43 = arith.constant dense<0.000000e+00> : vector<1x3xf32>
      %81 = tpu.matmul %78, %80, %cst_43 {dimension_numbers = #tpu.dot_dimension_numbers<[1], [0], [0], [1], [0, 0, 1, 1], [], []>} : vector<1x4xf32>, vector<4x3xf32>, vector<1x3xf32> -> vector<1x3xf32>
      %c0_44 = arith.constant 0 : index
      %c0_45 = arith.constant 0 : index
      %c0_46 = arith.constant 0 : index
      %82 = vector.load %arg8[%c0_44, %c0_45, %c0_46] : memref<3x4x1xf32, #tpu.memory_space<vmem>>, vector<1x4x1xf32>
      %83 = vector.shape_cast %82 : vector<1x4x1xf32> to vector<4x1xf32>
      %cst_47 = arith.constant dense<0.000000e+00> : vector<1x1xf32>
      %84 = tpu.matmul %78, %83, %cst_47 {dimension_numbers = #tpu.dot_dimension_numbers<[1], [0], [0], [1], [0, 0, 1, 1], [], []>} : vector<1x4xf32>, vector<4x1xf32>, vector<1x1xf32> -> vector<1x1xf32>
      %85 = vector.extract_strided_slice %81 {offsets = [0, 0], sizes = [1, 1], strides = [1, 1]} : vector<1x3xf32> to vector<1x1xf32>
      %86 = vector.broadcast %85 : vector<1x1xf32> to vector<1x128xf32>
      %87 = arith.mulf %86, %30 : vector<1x128xf32>
      %88 = vector.broadcast %84 : vector<1x1xf32> to vector<1x128xf32>
      %89 = arith.addf %88, %87 : vector<1x128xf32>
      %90 = vector.extract_strided_slice %81 {offsets = [0, 1], sizes = [1, 1], strides = [1, 1]} : vector<1x3xf32> to vector<1x1xf32>
      %91 = vector.broadcast %90 : vector<1x1xf32> to vector<1x128xf32>
      %92 = arith.mulf %91, %13 : vector<1x128xf32>
      %93 = arith.addf %89, %92 : vector<1x128xf32>
      %94 = vector.extract_strided_slice %81 {offsets = [0, 2], sizes = [1, 1], strides = [1, 1]} : vector<1x3xf32> to vector<1x1xf32>
      %95 = vector.broadcast %94 : vector<1x1xf32> to vector<1x128xf32>
      %96 = arith.mulf %95, %50 : vector<1x128xf32>
      %97 = arith.addf %93, %96 : vector<1x128xf32>
      %c1_48 = arith.constant 1 : index
      %c0_49 = arith.constant 0 : index
      %c0_50 = arith.constant 0 : index
      %98 = vector.load %arg4[%c1_48, %c0_49, %c0_50] : memref<3x32x9xf32, #tpu.memory_space<vmem>>, vector<1x32x9xf32>
      %99 = vector.shape_cast %98 : vector<1x32x9xf32> to vector<32x9xf32>
      %cst_51 = arith.constant dense<0.000000e+00> : vector<1x9xf32>
      %100 = tpu.matmul %55, %99, %cst_51 {dimension_numbers = #tpu.dot_dimension_numbers<[1], [0], [0], [1], [0, 0, 1, 1], [], []>} : vector<1x32xf32>, vector<32x9xf32>, vector<1x9xf32> -> vector<1x9xf32>
      %cst_52 = arith.constant 0.000000e+00 : f32
      %101 = vector.broadcast %cst_52 : f32 to vector<1x9xf32>
      %102 = arith.maximumf %100, %101 : vector<1x9xf32>
      %c1_53 = arith.constant 1 : index
      %c0_54 = arith.constant 0 : index
      %c0_55 = arith.constant 0 : index
      %103 = vector.load %arg5[%c1_53, %c0_54, %c0_55] : memref<3x9x4xf32, #tpu.memory_space<vmem>>, vector<1x9x4xf32>
      %104 = vector.shape_cast %103 : vector<1x9x4xf32> to vector<9x4xf32>
      %cst_56 = arith.constant dense<0.000000e+00> : vector<1x4xf32>
      %105 = tpu.matmul %102, %104, %cst_56 {dimension_numbers = #tpu.dot_dimension_numbers<[1], [0], [0], [1], [0, 0, 1, 1], [], []>} : vector<1x9xf32>, vector<9x4xf32>, vector<1x4xf32> -> vector<1x4xf32>
      %c1_57 = arith.constant 1 : index
      %c0_58 = arith.constant 0 : index
      %106 = vector.load %arg6[%c1_57, %c0_58] : memref<3x4xf32, #tpu.memory_space<vmem>>, vector<1x4xf32>
      %107 = vector.shape_cast %106 : vector<1x4xf32> to vector<4xf32>
      %108 = vector.shape_cast %107 : vector<4xf32> to vector<1x4xf32>
      %109 = arith.addf %105, %108 : vector<1x4xf32>
      %cst_59 = arith.constant 0.0294117648 : f32
      %110 = vector.broadcast %cst_59 : f32 to vector<1x4xf32>
      %111 = arith.mulf %109, %110 : vector<1x4xf32>
      %cst_60 = arith.constant dense<0xFF800000> : vector<1xf32>
      %112 = vector.multi_reduction <maximumf>, %111, %cst_60 [1] : vector<1x4xf32> to vector<1xf32>
      %113 = vector.shape_cast %112 : vector<1xf32> to vector<1x1xf32>
      %114 = vector.broadcast %113 : vector<1x1xf32> to vector<1x4xf32>
      %115 = arith.subf %111, %114 : vector<1x4xf32>
      %116 = math.exp %115 : vector<1x4xf32>
      %cst_61 = arith.constant dense<0.000000e+00> : vector<1xf32>
      %117 = vector.multi_reduction <add>, %116, %cst_61 [1] : vector<1x4xf32> to vector<1xf32>
      %118 = vector.shape_cast %117 : vector<1xf32> to vector<1x1xf32>
      %119 = vector.broadcast %118 : vector<1x1xf32> to vector<1x4xf32>
      %120 = arith.divf %116, %119 : vector<1x4xf32>
      %c1_62 = arith.constant 1 : index
      %c0_63 = arith.constant 0 : index
      %c0_64 = arith.constant 0 : index
      %121 = vector.load %arg7[%c1_62, %c0_63, %c0_64] : memref<3x4x3xf32, #tpu.memory_space<vmem>>, vector<1x4x3xf32>
      %122 = vector.shape_cast %121 : vector<1x4x3xf32> to vector<4x3xf32>
      %cst_65 = arith.constant dense<0.000000e+00> : vector<1x3xf32>
      %123 = tpu.matmul %120, %122, %cst_65 {dimension_numbers = #tpu.dot_dimension_numbers<[1], [0], [0], [1], [0, 0, 1, 1], [], []>} : vector<1x4xf32>, vector<4x3xf32>, vector<1x3xf32> -> vector<1x3xf32>
      %c1_66 = arith.constant 1 : index
      %c0_67 = arith.constant 0 : index
      %c0_68 = arith.constant 0 : index
      %124 = vector.load %arg8[%c1_66, %c0_67, %c0_68] : memref<3x4x1xf32, #tpu.memory_space<vmem>>, vector<1x4x1xf32>
      %125 = vector.shape_cast %124 : vector<1x4x1xf32> to vector<4x1xf32>
      %cst_69 = arith.constant dense<0.000000e+00> : vector<1x1xf32>
      %126 = tpu.matmul %120, %125, %cst_69 {dimension_numbers = #tpu.dot_dimension_numbers<[1], [0], [0], [1], [0, 0, 1, 1], [], []>} : vector<1x4xf32>, vector<4x1xf32>, vector<1x1xf32> -> vector<1x1xf32>
      %127 = vector.extract_strided_slice %123 {offsets = [0, 0], sizes = [1, 1], strides = [1, 1]} : vector<1x3xf32> to vector<1x1xf32>
      %c2_i32 = arith.constant 2 : i32
      %128 = tpu.dynamic_rotate %13 by %c2_i32 dim 1 : vector<1x128xf32>, i32 -> vector<1x128xf32>
      %c-2_i32 = arith.constant -2 : i32
      %129 = vector.broadcast %c-2_i32 : i32 to vector<1x128xi32>
      %130 = arith.addi %14, %129 : vector<1x128xi32>
      %c0_i32_70 = arith.constant 0 : i32
      %131 = vector.broadcast %c0_i32_70 : i32 to vector<1x128xi32>
      %132 = arith.cmpi sge, %130, %131 : vector<1x128xi32>
      %c-2_i32_71 = arith.constant -2 : i32
      %133 = vector.broadcast %c-2_i32_71 : i32 to vector<1x128xi32>
      %134 = arith.addi %14, %133 : vector<1x128xi32>
      %c8_i32_72 = arith.constant 8 : i32
      %135 = vector.broadcast %c8_i32_72 : i32 to vector<1x128xi32>
      %136 = arith.cmpi slt, %134, %135 : vector<1x128xi32>
      %137 = arith.andi %132, %136 : vector<1x128xi1>
      %cst_73 = arith.constant 0.000000e+00 : f32
      %138 = vector.broadcast %cst_73 : f32 to vector<1x128xf32>
      %139 = arith.select %137, %128, %138 : vector<1x128xi1>, vector<1x128xf32>
      %140 = vector.broadcast %127 : vector<1x1xf32> to vector<1x128xf32>
      %141 = arith.mulf %140, %139 : vector<1x128xf32>
      %142 = vector.broadcast %126 : vector<1x1xf32> to vector<1x128xf32>
      %143 = arith.addf %142, %141 : vector<1x128xf32>
      %144 = vector.extract_strided_slice %123 {offsets = [0, 1], sizes = [1, 1], strides = [1, 1]} : vector<1x3xf32> to vector<1x1xf32>
      %145 = vector.broadcast %144 : vector<1x1xf32> to vector<1x128xf32>
      %146 = arith.mulf %145, %13 : vector<1x128xf32>
      %147 = arith.addf %143, %146 : vector<1x128xf32>
      %148 = vector.extract_strided_slice %123 {offsets = [0, 2], sizes = [1, 1], strides = [1, 1]} : vector<1x3xf32> to vector<1x1xf32>
      %c126_i32 = arith.constant 126 : i32
      %149 = tpu.dynamic_rotate %13 by %c126_i32 dim 1 : vector<1x128xf32>, i32 -> vector<1x128xf32>
      %c2_i32_74 = arith.constant 2 : i32
      %150 = vector.broadcast %c2_i32_74 : i32 to vector<1x128xi32>
      %151 = arith.addi %14, %150 : vector<1x128xi32>
      %c0_i32_75 = arith.constant 0 : i32
      %152 = vector.broadcast %c0_i32_75 : i32 to vector<1x128xi32>
      %153 = arith.cmpi sge, %151, %152 : vector<1x128xi32>
      %c2_i32_76 = arith.constant 2 : i32
      %154 = vector.broadcast %c2_i32_76 : i32 to vector<1x128xi32>
      %155 = arith.addi %14, %154 : vector<1x128xi32>
      %c8_i32_77 = arith.constant 8 : i32
      %156 = vector.broadcast %c8_i32_77 : i32 to vector<1x128xi32>
      %157 = arith.cmpi slt, %155, %156 : vector<1x128xi32>
      %158 = arith.andi %153, %157 : vector<1x128xi1>
      %cst_78 = arith.constant 0.000000e+00 : f32
      %159 = vector.broadcast %cst_78 : f32 to vector<1x128xf32>
      %160 = arith.select %158, %149, %159 : vector<1x128xi1>, vector<1x128xf32>
      %161 = vector.broadcast %148 : vector<1x1xf32> to vector<1x128xf32>
      %162 = arith.mulf %161, %160 : vector<1x128xf32>
      %163 = arith.addf %147, %162 : vector<1x128xf32>
      %c2_79 = arith.constant 2 : index
      %c0_80 = arith.constant 0 : index
      %c0_81 = arith.constant 0 : index
      %164 = vector.load %arg4[%c2_79, %c0_80, %c0_81] : memref<3x32x9xf32, #tpu.memory_space<vmem>>, vector<1x32x9xf32>
      %165 = vector.shape_cast %164 : vector<1x32x9xf32> to vector<32x9xf32>
      %cst_82 = arith.constant dense<0.000000e+00> : vector<1x9xf32>
      %166 = tpu.matmul %55, %165, %cst_82 {dimension_numbers = #tpu.dot_dimension_numbers<[1], [0], [0], [1], [0, 0, 1, 1], [], []>} : vector<1x32xf32>, vector<32x9xf32>, vector<1x9xf32> -> vector<1x9xf32>
      %cst_83 = arith.constant 0.000000e+00 : f32
      %167 = vector.broadcast %cst_83 : f32 to vector<1x9xf32>
      %168 = arith.maximumf %166, %167 : vector<1x9xf32>
      %c2_84 = arith.constant 2 : index
      %c0_85 = arith.constant 0 : index
      %c0_86 = arith.constant 0 : index
      %169 = vector.load %arg5[%c2_84, %c0_85, %c0_86] : memref<3x9x4xf32, #tpu.memory_space<vmem>>, vector<1x9x4xf32>
      %170 = vector.shape_cast %169 : vector<1x9x4xf32> to vector<9x4xf32>
      %cst_87 = arith.constant dense<0.000000e+00> : vector<1x4xf32>
      %171 = tpu.matmul %168, %170, %cst_87 {dimension_numbers = #tpu.dot_dimension_numbers<[1], [0], [0], [1], [0, 0, 1, 1], [], []>} : vector<1x9xf32>, vector<9x4xf32>, vector<1x4xf32> -> vector<1x4xf32>
      %c2_88 = arith.constant 2 : index
      %c0_89 = arith.constant 0 : index
      %172 = vector.load %arg6[%c2_88, %c0_89] : memref<3x4xf32, #tpu.memory_space<vmem>>, vector<1x4xf32>
      %173 = vector.shape_cast %172 : vector<1x4xf32> to vector<4xf32>
      %174 = vector.shape_cast %173 : vector<4xf32> to vector<1x4xf32>
      %175 = arith.addf %171, %174 : vector<1x4xf32>
      %cst_90 = arith.constant 0.0294117648 : f32
      %176 = vector.broadcast %cst_90 : f32 to vector<1x4xf32>
      %177 = arith.mulf %175, %176 : vector<1x4xf32>
      %cst_91 = arith.constant dense<0xFF800000> : vector<1xf32>
      %178 = vector.multi_reduction <maximumf>, %177, %cst_91 [1] : vector<1x4xf32> to vector<1xf32>
      %179 = vector.shape_cast %178 : vector<1xf32> to vector<1x1xf32>
      %180 = vector.broadcast %179 : vector<1x1xf32> to vector<1x4xf32>
      %181 = arith.subf %177, %180 : vector<1x4xf32>
      %182 = math.exp %181 : vector<1x4xf32>
      %cst_92 = arith.constant dense<0.000000e+00> : vector<1xf32>
      %183 = vector.multi_reduction <add>, %182, %cst_92 [1] : vector<1x4xf32> to vector<1xf32>
      %184 = vector.shape_cast %183 : vector<1xf32> to vector<1x1xf32>
      %185 = vector.broadcast %184 : vector<1x1xf32> to vector<1x4xf32>
      %186 = arith.divf %182, %185 : vector<1x4xf32>
      %c2_93 = arith.constant 2 : index
      %c0_94 = arith.constant 0 : index
      %c0_95 = arith.constant 0 : index
      %187 = vector.load %arg7[%c2_93, %c0_94, %c0_95] : memref<3x4x3xf32, #tpu.memory_space<vmem>>, vector<1x4x3xf32>
      %188 = vector.shape_cast %187 : vector<1x4x3xf32> to vector<4x3xf32>
      %cst_96 = arith.constant dense<0.000000e+00> : vector<1x3xf32>
      %189 = tpu.matmul %186, %188, %cst_96 {dimension_numbers = #tpu.dot_dimension_numbers<[1], [0], [0], [1], [0, 0, 1, 1], [], []>} : vector<1x4xf32>, vector<4x3xf32>, vector<1x3xf32> -> vector<1x3xf32>
      %c2_97 = arith.constant 2 : index
      %c0_98 = arith.constant 0 : index
      %c0_99 = arith.constant 0 : index
      %190 = vector.load %arg8[%c2_97, %c0_98, %c0_99] : memref<3x4x1xf32, #tpu.memory_space<vmem>>, vector<1x4x1xf32>
      %191 = vector.shape_cast %190 : vector<1x4x1xf32> to vector<4x1xf32>
      %cst_100 = arith.constant dense<0.000000e+00> : vector<1x1xf32>
      %192 = tpu.matmul %186, %191, %cst_100 {dimension_numbers = #tpu.dot_dimension_numbers<[1], [0], [0], [1], [0, 0, 1, 1], [], []>} : vector<1x4xf32>, vector<4x1xf32>, vector<1x1xf32> -> vector<1x1xf32>
      %193 = vector.extract_strided_slice %189 {offsets = [0, 0], sizes = [1, 1], strides = [1, 1]} : vector<1x3xf32> to vector<1x1xf32>
      %c3_i32 = arith.constant 3 : i32
      %194 = tpu.dynamic_rotate %13 by %c3_i32 dim 1 : vector<1x128xf32>, i32 -> vector<1x128xf32>
      %c-3_i32 = arith.constant -3 : i32
      %195 = vector.broadcast %c-3_i32 : i32 to vector<1x128xi32>
      %196 = arith.addi %14, %195 : vector<1x128xi32>
      %c0_i32_101 = arith.constant 0 : i32
      %197 = vector.broadcast %c0_i32_101 : i32 to vector<1x128xi32>
      %198 = arith.cmpi sge, %196, %197 : vector<1x128xi32>
      %c-3_i32_102 = arith.constant -3 : i32
      %199 = vector.broadcast %c-3_i32_102 : i32 to vector<1x128xi32>
      %200 = arith.addi %14, %199 : vector<1x128xi32>
      %c8_i32_103 = arith.constant 8 : i32
      %201 = vector.broadcast %c8_i32_103 : i32 to vector<1x128xi32>
      %202 = arith.cmpi slt, %200, %201 : vector<1x128xi32>
      %203 = arith.andi %198, %202 : vector<1x128xi1>
      %cst_104 = arith.constant 0.000000e+00 : f32
      %204 = vector.broadcast %cst_104 : f32 to vector<1x128xf32>
      %205 = arith.select %203, %194, %204 : vector<1x128xi1>, vector<1x128xf32>
      %206 = vector.broadcast %193 : vector<1x1xf32> to vector<1x128xf32>
      %207 = arith.mulf %206, %205 : vector<1x128xf32>
      %208 = vector.broadcast %192 : vector<1x1xf32> to vector<1x128xf32>
      %209 = arith.addf %208, %207 : vector<1x128xf32>
      %210 = vector.extract_strided_slice %189 {offsets = [0, 1], sizes = [1, 1], strides = [1, 1]} : vector<1x3xf32> to vector<1x1xf32>
      %211 = vector.broadcast %210 : vector<1x1xf32> to vector<1x128xf32>
      %212 = arith.mulf %211, %13 : vector<1x128xf32>
      %213 = arith.addf %209, %212 : vector<1x128xf32>
      %214 = vector.extract_strided_slice %189 {offsets = [0, 2], sizes = [1, 1], strides = [1, 1]} : vector<1x3xf32> to vector<1x1xf32>
      %c125_i32 = arith.constant 125 : i32
      %215 = tpu.dynamic_rotate %13 by %c125_i32 dim 1 : vector<1x128xf32>, i32 -> vector<1x128xf32>
      %c3_i32_105 = arith.constant 3 : i32
      %216 = vector.broadcast %c3_i32_105 : i32 to vector<1x128xi32>
      %217 = arith.addi %14, %216 : vector<1x128xi32>
      %c0_i32_106 = arith.constant 0 : i32
      %218 = vector.broadcast %c0_i32_106 : i32 to vector<1x128xi32>
      %219 = arith.cmpi sge, %217, %218 : vector<1x128xi32>
      %c3_i32_107 = arith.constant 3 : i32
      %220 = vector.broadcast %c3_i32_107 : i32 to vector<1x128xi32>
      %221 = arith.addi %14, %220 : vector<1x128xi32>
      %c8_i32_108 = arith.constant 8 : i32
      %222 = vector.broadcast %c8_i32_108 : i32 to vector<1x128xi32>
      %223 = arith.cmpi slt, %221, %222 : vector<1x128xi32>
      %224 = arith.andi %219, %223 : vector<1x128xi1>
      %cst_109 = arith.constant 0.000000e+00 : f32
      %225 = vector.broadcast %cst_109 : f32 to vector<1x128xf32>
      %226 = arith.select %224, %215, %225 : vector<1x128xi1>, vector<1x128xf32>
      %227 = vector.broadcast %214 : vector<1x1xf32> to vector<1x128xf32>
      %228 = arith.mulf %227, %226 : vector<1x128xf32>
      %229 = arith.addf %213, %228 : vector<1x128xf32>
      %cst_110 = arith.constant 0.000000e+00 : f32
      %230 = vector.broadcast %cst_110 : f32 to vector<1x128xf32>
      %c0_111 = arith.constant 0 : index
      %231 = memref.load %arg11[%c0_111] : memref<1xf32, #tpu.memory_space<smem>>
      %232 = vector.broadcast %231 : f32 to vector<1x128xf32>
      %233 = arith.addf %230, %232 : vector<1x128xf32>
      %cst_112 = arith.constant 0.000000e+00 : f32
      %234 = vector.broadcast %cst_112 : f32 to vector<1x128xf32>
      %235 = arith.select %16, %53, %234 : vector<1x128xi1>, vector<1x128xf32>
      %cst_113 = arith.constant dense<0.000000e+00> : vector<1xf32>
      %236 = vector.multi_reduction <add>, %235, %cst_113 [1] : vector<1x128xf32> to vector<1xf32>
      %237 = vector.shape_cast %236 : vector<1xf32> to vector<1x1xf32>
      %cst_114 = arith.constant 1.250000e-01 : f32
      %238 = vector.broadcast %cst_114 : f32 to vector<1x1xf32>
      %239 = arith.mulf %237, %238 : vector<1x1xf32>
      %240 = vector.broadcast %239 : vector<1x1xf32> to vector<1x128xf32>
      %241 = arith.subf %53, %240 : vector<1x128xf32>
      %242 = arith.mulf %241, %241 : vector<1x128xf32>
      %cst_115 = arith.constant 0.000000e+00 : f32
      %243 = vector.broadcast %cst_115 : f32 to vector<1x128xf32>
      %244 = arith.select %16, %242, %243 : vector<1x128xi1>, vector<1x128xf32>
      %cst_116 = arith.constant dense<0.000000e+00> : vector<1xf32>
      %245 = vector.multi_reduction <add>, %244, %cst_116 [1] : vector<1x128xf32> to vector<1xf32>
      %246 = vector.shape_cast %245 : vector<1xf32> to vector<1x1xf32>
      %cst_117 = arith.constant 1.250000e-01 : f32
      %247 = vector.broadcast %cst_117 : f32 to vector<1x1xf32>
      %248 = arith.mulf %246, %247 : vector<1x1xf32>
      %c0_118 = arith.constant 0 : index
      %249 = memref.load %arg10[%c0_118] : memref<4xf32, #tpu.memory_space<smem>>
      %cst_119 = arith.constant 9.99999974E-6 : f32
      %250 = vector.broadcast %cst_119 : f32 to vector<1x1xf32>
      %251 = arith.addf %248, %250 : vector<1x1xf32>
      %252 = math.rsqrt %251 : vector<1x1xf32>
      %253 = vector.broadcast %252 : vector<1x1xf32> to vector<1x128xf32>
      %254 = arith.mulf %241, %253 : vector<1x128xf32>
      %255 = vector.broadcast %249 : f32 to vector<1x128xf32>
      %256 = arith.mulf %255, %254 : vector<1x128xf32>
      %257 = arith.addf %233, %256 : vector<1x128xf32>
      %cst_120 = arith.constant 0.000000e+00 : f32
      %258 = vector.broadcast %cst_120 : f32 to vector<1x128xf32>
      %259 = arith.select %16, %97, %258 : vector<1x128xi1>, vector<1x128xf32>
      %cst_121 = arith.constant dense<0.000000e+00> : vector<1xf32>
      %260 = vector.multi_reduction <add>, %259, %cst_121 [1] : vector<1x128xf32> to vector<1xf32>
      %261 = vector.shape_cast %260 : vector<1xf32> to vector<1x1xf32>
      %cst_122 = arith.constant 1.250000e-01 : f32
      %262 = vector.broadcast %cst_122 : f32 to vector<1x1xf32>
      %263 = arith.mulf %261, %262 : vector<1x1xf32>
      %264 = vector.broadcast %263 : vector<1x1xf32> to vector<1x128xf32>
      %265 = arith.subf %97, %264 : vector<1x128xf32>
      %266 = arith.mulf %265, %265 : vector<1x128xf32>
      %cst_123 = arith.constant 0.000000e+00 : f32
      %267 = vector.broadcast %cst_123 : f32 to vector<1x128xf32>
      %268 = arith.select %16, %266, %267 : vector<1x128xi1>, vector<1x128xf32>
      %cst_124 = arith.constant dense<0.000000e+00> : vector<1xf32>
      %269 = vector.multi_reduction <add>, %268, %cst_124 [1] : vector<1x128xf32> to vector<1xf32>
      %270 = vector.shape_cast %269 : vector<1xf32> to vector<1x1xf32>
      %cst_125 = arith.constant 1.250000e-01 : f32
      %271 = vector.broadcast %cst_125 : f32 to vector<1x1xf32>
      %272 = arith.mulf %270, %271 : vector<1x1xf32>
      %c1_126 = arith.constant 1 : index
      %273 = memref.load %arg10[%c1_126] : memref<4xf32, #tpu.memory_space<smem>>
      %cst_127 = arith.constant 9.99999974E-6 : f32
      %274 = vector.broadcast %cst_127 : f32 to vector<1x1xf32>
      %275 = arith.addf %272, %274 : vector<1x1xf32>
      %276 = math.rsqrt %275 : vector<1x1xf32>
      %277 = vector.broadcast %276 : vector<1x1xf32> to vector<1x128xf32>
      %278 = arith.mulf %265, %277 : vector<1x128xf32>
      %279 = vector.broadcast %273 : f32 to vector<1x128xf32>
      %280 = arith.mulf %279, %278 : vector<1x128xf32>
      %281 = arith.addf %257, %280 : vector<1x128xf32>
      %cst_128 = arith.constant 0.000000e+00 : f32
      %282 = vector.broadcast %cst_128 : f32 to vector<1x128xf32>
      %283 = arith.select %16, %163, %282 : vector<1x128xi1>, vector<1x128xf32>
      %cst_129 = arith.constant dense<0.000000e+00> : vector<1xf32>
      %284 = vector.multi_reduction <add>, %283, %cst_129 [1] : vector<1x128xf32> to vector<1xf32>
      %285 = vector.shape_cast %284 : vector<1xf32> to vector<1x1xf32>
      %cst_130 = arith.constant 1.250000e-01 : f32
      %286 = vector.broadcast %cst_130 : f32 to vector<1x1xf32>
      %287 = arith.mulf %285, %286 : vector<1x1xf32>
      %288 = vector.broadcast %287 : vector<1x1xf32> to vector<1x128xf32>
      %289 = arith.subf %163, %288 : vector<1x128xf32>
      %290 = arith.mulf %289, %289 : vector<1x128xf32>
      %cst_131 = arith.constant 0.000000e+00 : f32
      %291 = vector.broadcast %cst_131 : f32 to vector<1x128xf32>
      %292 = arith.select %16, %290, %291 : vector<1x128xi1>, vector<1x128xf32>
      %cst_132 = arith.constant dense<0.000000e+00> : vector<1xf32>
      %293 = vector.multi_reduction <add>, %292, %cst_132 [1] : vector<1x128xf32> to vector<1xf32>
      %294 = vector.shape_cast %293 : vector<1xf32> to vector<1x1xf32>
      %cst_133 = arith.constant 1.250000e-01 : f32
      %295 = vector.broadcast %cst_133 : f32 to vector<1x1xf32>
      %296 = arith.mulf %294, %295 : vector<1x1xf32>
      %c2_134 = arith.constant 2 : index
      %297 = memref.load %arg10[%c2_134] : memref<4xf32, #tpu.memory_space<smem>>
      %cst_135 = arith.constant 9.99999974E-6 : f32
      %298 = vector.broadcast %cst_135 : f32 to vector<1x1xf32>
      %299 = arith.addf %296, %298 : vector<1x1xf32>
      %300 = math.rsqrt %299 : vector<1x1xf32>
      %301 = vector.broadcast %300 : vector<1x1xf32> to vector<1x128xf32>
      %302 = arith.mulf %289, %301 : vector<1x128xf32>
      %303 = vector.broadcast %297 : f32 to vector<1x128xf32>
      %304 = arith.mulf %303, %302 : vector<1x128xf32>
      %305 = arith.addf %281, %304 : vector<1x128xf32>
      %cst_136 = arith.constant 0.000000e+00 : f32
      %306 = vector.broadcast %cst_136 : f32 to vector<1x128xf32>
      %307 = arith.select %16, %229, %306 : vector<1x128xi1>, vector<1x128xf32>
      %cst_137 = arith.constant dense<0.000000e+00> : vector<1xf32>
      %308 = vector.multi_reduction <add>, %307, %cst_137 [1] : vector<1x128xf32> to vector<1xf32>
      %309 = vector.shape_cast %308 : vector<1xf32> to vector<1x1xf32>
      %cst_138 = arith.constant 1.250000e-01 : f32
      %310 = vector.broadcast %cst_138 : f32 to vector<1x1xf32>
      %311 = arith.mulf %309, %310 : vector<1x1xf32>
      %312 = vector.broadcast %311 : vector<1x1xf32> to vector<1x128xf32>
      %313 = arith.subf %229, %312 : vector<1x128xf32>
      %314 = arith.mulf %313, %313 : vector<1x128xf32>
      %cst_139 = arith.constant 0.000000e+00 : f32
      %315 = vector.broadcast %cst_139 : f32 to vector<1x128xf32>
      %316 = arith.select %16, %314, %315 : vector<1x128xi1>, vector<1x128xf32>
      %cst_140 = arith.constant dense<0.000000e+00> : vector<1xf32>
      %317 = vector.multi_reduction <add>, %316, %cst_140 [1] : vector<1x128xf32> to vector<1xf32>
      %318 = vector.shape_cast %317 : vector<1xf32> to vector<1x1xf32>
      %cst_141 = arith.constant 1.250000e-01 : f32
      %319 = vector.broadcast %cst_141 : f32 to vector<1x1xf32>
      %320 = arith.mulf %318, %319 : vector<1x1xf32>
      %c3 = arith.constant 3 : index
      %321 = memref.load %arg10[%c3] : memref<4xf32, #tpu.memory_space<smem>>
      %cst_142 = arith.constant 9.99999974E-6 : f32
      %322 = vector.broadcast %cst_142 : f32 to vector<1x1xf32>
      %323 = arith.addf %320, %322 : vector<1x1xf32>
      %324 = math.rsqrt %323 : vector<1x1xf32>
      %325 = vector.broadcast %324 : vector<1x1xf32> to vector<1x128xf32>
      %326 = arith.mulf %313, %325 : vector<1x128xf32>
      %327 = vector.broadcast %321 : f32 to vector<1x128xf32>
      %328 = arith.mulf %327, %326 : vector<1x128xf32>
      %329 = arith.addf %305, %328 : vector<1x128xf32>
      %cst_143 = arith.constant 5.000000e-01 : f32
      %330 = vector.broadcast %cst_143 : f32 to vector<1x128xf32>
      %331 = arith.mulf %330, %329 : vector<1x128xf32>
      %332 = math.tanh %331 : vector<1x128xf32>
      %cst_144 = arith.constant 1.000000e+00 : f32
      %333 = vector.broadcast %cst_144 : f32 to vector<1x128xf32>
      %334 = arith.addf %332, %333 : vector<1x128xf32>
      %cst_145 = arith.constant 5.000000e-01 : f32
      %335 = vector.broadcast %cst_145 : f32 to vector<1x128xf32>
      %336 = arith.mulf %335, %334 : vector<1x128xf32>
      %337 = vector.shape_cast %336 : vector<1x128xf32> to vector<1x1x128xf32>
      %c0_146 = arith.constant 0 : index
      %c0_147 = arith.constant 0 : index
      %c0_148 = arith.constant 0 : index
      %338 = vector.load %arg12[%c0_146, %c0_147, %c0_148] : memref<1x1x128xf32, #tpu.memory_space<vmem>>, vector<1x1x128xf32>
      tpu.vector_store %arg12[%c0_146, %c0_147, %c0_148], %337 {strides = array<i32>} : memref<1x1x128xf32, #tpu.memory_space<vmem>>, vector<1x1x128xf32>,
    } else {
    }
    return
  }
  func.func @transform_0(%arg0: i32, %arg1: i32) -> (i32, i32, i32) {
    %c0_i32 = arith.constant 0 : i32
    %c0_i32_0 = arith.constant 0 : i32
    return %arg0, %c0_i32, %arg1 : i32, i32, i32
  }
  func.func @transform_1(%arg0: i32, %arg1: i32) -> (i32, i32, i32) {
    %c0_i32 = arith.constant 0 : i32
    %c0_i32_0 = arith.constant 0 : i32
    %c0_i32_1 = arith.constant 0 : i32
    return %arg0, %c0_i32, %c0_i32_0 : i32, i32, i32
  }
  func.func @transform_2(%arg0: i32, %arg1: i32) -> (i32, i32, i32) {
    %c0_i32 = arith.constant 0 : i32
    %c0_i32_0 = arith.constant 0 : i32
    %c0_i32_1 = arith.constant 0 : i32
    %c0_i32_2 = arith.constant 0 : i32
    return %c0_i32, %c0_i32_0, %c0_i32_1 : i32, i32, i32
  }
  func.func @transform_3(%arg0: i32, %arg1: i32) -> (i32, i32, i32) {
    %c0_i32 = arith.constant 0 : i32
    %c0_i32_0 = arith.constant 0 : i32
    %c0_i32_1 = arith.constant 0 : i32
    %c0_i32_2 = arith.constant 0 : i32
    return %c0_i32, %c0_i32_0, %c0_i32_1 : i32, i32, i32
  }
  func.func @transform_4(%arg0: i32, %arg1: i32) -> (i32, i32) {
    %c0_i32 = arith.constant 0 : i32
    %c0_i32_0 = arith.constant 0 : i32
    %c0_i32_1 = arith.constant 0 : i32
    return %c0_i32, %c0_i32_0 : i32, i32
  }
  func.func @transform_5(%arg0: i32, %arg1: i32) -> (i32, i32, i32) {
    %c0_i32 = arith.constant 0 : i32
    %c0_i32_0 = arith.constant 0 : i32
    %c0_i32_1 = arith.constant 0 : i32
    %c0_i32_2 = arith.constant 0 : i32
    return %c0_i32, %c0_i32_0, %c0_i32_1 : i32, i32, i32
  }
  func.func @transform_6(%arg0: i32, %arg1: i32) -> (i32, i32, i32) {
    %c0_i32 = arith.constant 0 : i32
    %c0_i32_0 = arith.constant 0 : i32
    %c0_i32_1 = arith.constant 0 : i32
    %c0_i32_2 = arith.constant 0 : i32
    return %c0_i32, %c0_i32_0, %c0_i32_1 : i32, i32, i32
  }
  func.func @transform_7(%arg0: i32, %arg1: i32) -> i32 {
    %c0_i32 = arith.constant 0 : i32
    %c0_i32_0 = arith.constant 0 : i32
    return %c0_i32 : i32
  }
  func.func @transform_8(%arg0: i32, %arg1: i32) -> i32 {
    %c0_i32 = arith.constant 0 : i32
    %c0_i32_0 = arith.constant 0 : i32
    return %c0_i32 : i32
  }
  func.func @transform_9(%arg0: i32, %arg1: i32) -> i32 {
    %c0_i32 = arith.constant 0 : i32
    %c0_i32_0 = arith.constant 0 : i32
    return %c0_i32 : i32
  }
  func.func @transform_10(%arg0: i32, %arg1: i32) -> (i32, i32, i32) {
    %c0_i32 = arith.constant 0 : i32
    %c0_i32_0 = arith.constant 0 : i32
    %c0_i32_1 = arith.constant 0 : i32
    return %arg0, %c0_i32, %c0_i32_0 : i32, i32, i32
  }
}

</mosaic_0001>

<bundles_post_ra>
// kernel: tpu_custom_call.1
= control target key start
LH: loop header
LB: loop body
LE: loop exit
PB: predicated region body
PF: predicated region fallthrough
CT: control target
= control target key end

     0   :  { %s2976_s0 = inlined_call_operand.hbm [shape: f32[2,8,4096], index: 0, kind: input, shape index: {}]   ;;  %s2977_s1 = inlined_call_operand.vmem [shape: f32[2,1,32], index: 1, kind: input, shape index: {}]   ;;  %s2978_s2 = inlined_call_operand.vmem [shape: f32[3,32,9], index: 2, kind: input, shape index: {}]   ;;  %s2979_s3 = inlined_call_operand.vmem [shape: f32[3,9,4], index: 3, kind: input, shape index: {}]   ;;  %s2980_s4 = inlined_call_operand.vmem [shape: f32[3,4], index: 4, kind: input, shape index: {}]   ;;  %s2981_s5 = inlined_call_operand.vmem [shape: f32[3,4,3], index: 5, kind: input, shape index: {}]   ;;  %s2982_s6 = inlined_call_operand.vmem [shape: f32[3,4,1], index: 6, kind: input, shape index: {}]   ;;  %s2983_s7 = inlined_call_operand.vmem [shape: f32[3], index: 7, kind: input, shape index: {}]   ;;  %s2984_s8 = inlined_call_operand.vmem [shape: f32[4], index: 8, kind: input, shape index: {}]   ;;  %s2985_s9 = inlined_call_operand.<no memory space> [shape: f32[1], index: 9, kind: input, shape index: {}]   ;;  %s2986_s10 = inlined_call_operand.hbm [shape: f32[2,1,128], index: 10, kind: output, shape index: {}]  }
   0x1   :  { %2992 = sst [smem:[#allocation17_spill]] %s2983_s7 }
   0x2   :  { %2993 = sst [smem:[#allocation18_spill]] %s2984_s8 }
   0x3   :  { %15 = sst [smem:[#allocation3]] %s2985_s9 }
   0x4   :  { %16 = vsyncpa [#allocation5], 0 }
   0x5   :  { %18 = vsyncpa [#allocation5 + $0x1], 0 }
   0x6   :  { %19 = vsyncpa [#allocation7], 0 }
   0x7   :  { %20 = vsyncpa [#allocation10], 0 }
   0x8   :  { %21 = vsyncpa [#allocation6], 0 }
   0x9   :  { %23 = vsyncpa [#allocation6 + $0x1], 0  ;;  %s2486_s15 = smov 0   ;;  %s2488_s16 = smov 0  }
   0xa   :  { %s2490_s17 = smov 0   ;;  %s2492_s18 = smov 0  }
   0xb   :  { %s2494_s19 = smov 0   ;;  %s2496_s20 = smov 0  }
   0xc LB: > { %s1920_s9 = sadd.s32 4294967295, %s2408_s20   ;;  %s1921_s21 = sadd.s32 4294967294, %s2408_s20   ;;  %s2408_s20 = sphi %s2496_s20, %s29_s20   ;;  %s2404_s19 = sphi %s2494_s19, %s3018_s19   ;;  %s2400_s18 = sphi %s2492_s18, %s3017_s18   ;;  %s2396_s17 = sphi %s2490_s17, %s3016_s17   ;;  %s2392_s16 = sphi %s2488_s16, %s3015_s16   ;;  %s2388_s15 = sphi %s2486_s15, %s3014_s15  }
   0xd   : > { %p63_p0 = scmp.ne.s32.totalorder %s2392_s16, %s2388_s15  ;;  %p2520_p1 = scmp.eq.s32.totalorder %s1920_s9, 0 }
   0xe   : > { %p2524_p2 = scmp.eq.s32.totalorder %s1920_s9, 1  ;;  %p287_p3 = scmp.eq.s32.totalorder %s1921_s21, 1 }
   0xf   : > { %s2994_s22 = scalar_select %p2520_p1, 1, 0 }
  0x10   : > { %s2995_s23 = scalar_select %p2524_p2, 1, 0 }
  0x11   : > { %p2530_p4 = por %p2520_p1, %p63_p0  ;;  %p1922_p5 = scmp.ge.s32.totalorder %s2408_s20, 1 }
  0x12   : > { %p2535_p6 = por %p287_p3, %p63_p0  ;;  %p294_p7 = scmp.lt.s32.totalorder %s2408_s20, 3 }
  0x13   : > { %s2996_s24 = scalar_select %p2530_p4, 1, 0 }
  0x14   : > { %s2997_s25 = scalar_select %p2535_p6, 1, 0 }
  0x15   : > { %s2998_s7 = sld [smem:[#allocation17_spill]]  ;;  %p2543_p8 = pnand %p1922_p5, %p294_p7 }
  0x16   : > { %s3000_s8 = sld [smem:[#allocation18_spill]] }
  0x17   : > { %s2999_s29 = scalar_select %p2543_p8, 1, 0 }
  0x18   : > { %p2141_p10 = pneg %p2543_p8 }
  0x1a   : > { %p2555_p11 = pnand %p2141_p10, %p2520_p1 }
  0x1b   : > { %s322_s28 = sshll.u32 %s2998_s7, 4  ;;  %s323_s28 = int_to_ptr.vmem [resolvable:$true] %s322_s28 }
  0x1c   : > { %s333_s12 = sshll.u32 %s3000_s8, 4  ;;  %s2258_s14 = scalar_lea.vmem %s323_s28, 16  ;;  %s334_s12 = int_to_ptr.vmem [resolvable:$true] %s333_s12 }
  0x1d   : > { %p2259_p12 = scmp.ne.s32.totalorder %s323_s28, %s2258_s14  ;;  %p2260_p13 = pneg %p2555_p11 }
  0x1e   : > { %p2266_p5 = scmp.lt.s32.totalorder %s323_s28, %s323_s28  ;;  %p2267_p7 = scmp.lt.s32.totalorder %s2258_s14, %s2258_s14 }
  0x1f   : > { %p2261_p0 = pnand %p2260_p13, %p2259_p12 }
  0x20   : > { %p2268_p9 = por %p2267_p7, %p2266_p5 }
  0x21   : > { %p2262_p3 = pneg %p2261_p0 }
  0x23   : > { %p2269_p6 = pnand %p2268_p9, %p2262_p3 }
  0x25   : > { %2272 = shalt.err (!%p2269_p6)
}
  0x26   : > { %s2410_s9 = smov [#allocation8]   ;;  %s2273_s21 = scalar_lea.vmem %s334_s12, 16 }
  0x27   : > { %2144 = dma.vmem_to_smem (!%p2555_p11), %s323_s28, 16, %s2410_s9, [#allocation7]  }
  0x28   : > { %p2274_p10 = scmp.ne.s32.totalorder %s334_s12, %s2273_s21  ;;  %p2281_p8 = scmp.lt.s32.totalorder %s334_s12, %s334_s12 }
  0x29   : > { %p2282_p2 = scmp.lt.s32.totalorder %s2273_s21, %s2273_s21 }
  0x2a   : > { %p2276_p1 = pnand %p2274_p10, %p2260_p13 }
  0x2b   : > { %p2283_p12 = por %p2282_p2, %p2281_p8 }
  0x2c   : > { %p2277_p4 = pneg %p2276_p1 }
  0x2e   : > { %p2284_p0 = pnand %p2283_p12, %p2277_p4 }
  0x30   : > { %2287 = shalt.err (!%p2284_p0)
}
  0x31   : > { %s2411_s26 = smov [#allocation9]   ;;  %s41_s27 = sadd.s32 1, %s2404_s19 }
  0x32   : > { %2147 = dma.vmem_to_smem (!%p2555_p11), %s334_s12, 16, %s2411_s26, [#allocation10]  }
  0x33   : > { %s50_s28 = sadd.s32 1, %s2396_s17  ;;  %p43_p1 = scmp.ge.s32.totalorder %s41_s27, 2 }
  0x34   : > { %p57_p2 = scmp.ne.s32.totalorder %s2396_s17, %s2392_s16  ;;  %p58_p4 = scmp.eq.s32.totalorder %s2408_s20, 0 }
  0x35   : > { %p2158_p6 = scmp.lt.s32.totalorder %s2408_s20, 2  ;;  %s3020_s27 = smov (%p43_p1, %s41_s27), 0 }
  0x36   : > { %3002 = sst [smem:[#allocation16_spill]] %s3020_s27  ;;  %p59_p8 = por %p58_p4, %p57_p2 }
  0x37   : > { %p3003_p9 = scmp.ne.s32.totalorder %s2995_s23, 0  ;;  %s45_s11 = ssub.s32 %s2404_s19, %s3020_s27 }
  0x38   : > { %s347_s13 = sand.u32 1, %s2396_s17   ;;  %p48_p3 = scmp.eq.s32.totalorder %s45_s11, 0 }
  0x39   : > { %p2575_p13 = por %p3003_p9, %p57_p2  ;;  %s1926_s12 = sshll.u32 %s347_s13, 8 }
  0x3a   : > { %s1978_s14 = sshll.u32 %s2404_s19, 12  ;;  %s351_s23 = scalar_lea.vmem [#allocation4], %s1926_s12 }
  0x3b   : > { %s2584_s9 = scalar_select %p48_p3, %s2396_s17, %s50_s28  }
  0x3c   : > { %s2589_s7 = scalar_lea.hbm %s2976_s0, %s1978_s14  ;;  %s361_s8 = sshll.u32 %s351_s23, 4  ;;  %s2597_s8 = int_to_ptr.vmem [resolvable:$true] %s361_s8 }
  0x3d   : > { %p2593_p11 = pnand %p2158_p6, %p59_p8  ;;  %s348_s28 = scalar_lea.sflag [#allocation5], %s347_s13 }
  0x3e   : > { %s2288_s11 = scalar_lea.hbm %s2589_s7, 4096  ;;  %s2293_s21 = scalar_lea.hbm %s2976_s0, 8192 }
  0x3f   : > { %p2289_p5 = scmp.ne.s32.totalorder %s2589_s7, %s2288_s11  ;;  %p2290_p7 = pneg %p2593_p11 }
  0x40   : > { %p2294_p0 = scmp.lt.u32.totalorder %s2589_s7, %s2976_s0  ;;  %p2295_p1 = scmp.lt.u32.totalorder %s2293_s21, %s2288_s11 }
  0x41   : > { %p2291_p10 = pnand %p2290_p7, %p2289_p5  ;;  %p2297_p4 = scmp.lt.u32.totalorder %s2288_s11, %s2589_s7 }
  0x42   : > { %p2296_p2 = por %p2295_p1, %p2294_p0 }
  0x43   : > { %p2292_p12 = pneg %p2291_p10 }
  0x44   : > { %p2298_p6 = por %p2297_p4, %p2296_p2 }
  0x46   : > { %p2299_p8 = pnand %p2298_p6, %p2292_p12 }
  0x48   : > { %2302 = shalt.err (!%p2299_p8)
}
  0x49   : > { %s2303_s13 = scalar_lea.vmem %s2597_s8, 4096  ;;  %s2412_s12 = smov [#allocation4]  }
  0x4a   : > { %p2304_p9 = scmp.ne.s32.totalorder %s2597_s8, %s2303_s13  ;;  %s2308_s14 = sshll.u32 %s2412_s12, 4  ;;  %s2309_s14 = int_to_ptr.vmem [resolvable:$false] %s2308_s14 }
  0x4b   : > { %s2310_s26 = scalar_lea.vmem %s2309_s14, 8192  ;;  %p2311_p10 = scmp.lt.s32.totalorder %s2597_s8, %s2309_s14 }
  0x4c   : > { %p2306_p3 = pnand %p2304_p9, %p2290_p7  ;;  %p2312_p0 = scmp.lt.s32.totalorder %s2310_s26, %s2303_s13 }
  0x4e   : > { %p2307_p5 = pneg %p2306_p3  ;;  %p2313_p1 = por %p2312_p0, %p2311_p10 }
  0x50   : > { %p2314_p2 = pnand %p2313_p1, %p2307_p5 }
  0x52   : > { %2317 = shalt.err (!%p2314_p2)
}
  0x53   : > { %2151 = dma.hbm_to_vmem [thread:$0]  (!%p2593_p11), %s2589_s7, 4096, %s2597_s8, %s348_s28  }
  0x54   : > { %p3006_p12 = scmp.ne.s32.totalorder %s2999_s29, 0 }
  0x55   : > { %s2627_s11 = sand.u32 (!%p3006_p12), 1, %s2392_s16   ;;  %p3007_p7 = scmp.ne.s32.totalorder (!%p3006_p12), %s2996_s24, 0 }
  0x56   : > { %376 = sbr.rel (%p3006_p12) target bundleno = 3067 (0xbfb), region = 60  ;;  %s1930_s21 = sshll.u32 (!%p3006_p12), %s2627_s11, 8 }
  0x57   : > { %s379_s23 = scalar_lea.sflag (!%p3006_p12), [#allocation5], %s2627_s11  ;;  %s2631_s13 = scalar_lea.vmem (!%p3006_p12), [#allocation4], %s1930_s21 }
  0x5d   : > { %2371 = dma.done.wait (%p3007_p7), %s379_s23, 4096  }
  0x5e   : > { %2373 = vsyncadd (%p3007_p7), %s379_s23, 4294963200  ;;  %p3008_p11 = scmp.ne.s32.totalorder %s2994_s22, 0 }
  0x60   : > { %2375 = dma.done.wait (%p3008_p11), [#allocation7], 16  }
  0x61   : > { %2377 = vsyncadd (%p3008_p11), [#allocation7], 4294967280 }
  0x62   : > { %2379 = dma.done.wait (%p3008_p11), [#allocation10], 16  }
  0x63   : > { %2381 = vsyncadd (%p3008_p11), [#allocation10], 4294967280 }
  0x64   : > { %395 = sfence }
  0x65   : > { %v647_v0 = vld [vmem:[%s2978_s2] sm:$0xff]  ;;  %v648_v1 = vld [vmem:[%s2978_s2 + $0x8] sm:$0xff]  ;;  %v649_v2 = vld [vmem:[%s2978_s2 + $0x10] sm:$0xff]  ;;  %v2413_v3 = vmov 0.0|0.0   ;;  %vm2414_vm0 = vmmov 0   ;;  %v2415_v6 = vmov 0.0  }
  0x66   : > { %2099 = vmatprep.subr.bf16.mxu0 %v2413_v3  ;;  %v2100_v4 = vpack.c.bf16 %v648_v1, %v647_v0  ;;  %v650_v5 = vld [vmem:[%s2978_s2 + $0x18] sm:$0xff]  ;;  %2023 = vmatprep.mubr.msk.f32.mxu0 %vm2414_vm0, %v2415_v6  ;;  %438 = vst [vmem:[#allocation2] sm:$0x1] %v2415_v6  ;;  %p431_p4 = scmp.lt.s32.totalorder %s2400_s18, 1  ;;  %vm651_vm1 = vcmask 261120   ;;  %v726_v9 = vld [vmem:[%s2979_s3] sm:$0xff] }
  0x67   : > { %2105 = vmatprep.subr.bf16.mxu1 %v2413_v3  ;;  %2030 = vmatprep.mubr.msk.f32.mxu1 %vm2414_vm0, %v2415_v6  ;;  %v2103_v7 = vpack.c.bf16 %v650_v5, %v649_v2  ;;  %v727_v10 = vld [vmem:[%s2979_s3 + $0x8] sm:$0x1]  ;;  %vm733_vm2 = vcmask 1040384   ;;  %vm2416_vm3 = vmmov 1   ;;  %vm729_vm5 = vcmask 72704   ;;  %v1942_v30 = vld [vmem:[%s2978_s2 + $0x20] sm:$0xff] }
  0x68   : > { %2101 = vmatpush3.bf16.msra.mxu0 %v2100_v4  ;;  %s432_s14 = scalar_select %p431_p4, %s2400_s18, 1  ;;  %v2106_v11 = vpack.c.bf16 %v727_v10, %v726_v9  ;;  %vm2684_vm4 = vmpackc.low %vm733_vm2, %vm2416_vm3  ;;  %v728_v16 = vld [vmem:[%s2980_s4] sm:$0x1]  ;;  %vm808_vm6 = vcmask 24576   ;;  %vm825_vm7 = vcmask 1043456   ;;  %v1943_v31 = vld [vmem:[%s2978_s2 + $0x28] sm:$0xff] }
  0x69   : > { %2102 = vmatprep.subr.bf16.mxu0 %v2413_v3  ;;  %v820_v27 = vld [vmem:[%s2981_s5] sm:$0xf]  ;;  %vm821_vm8 = vcmask 31744   ;;  %v2110_v33 = vpack.c.bf16 %v1943_v31, %v1942_v30  ;;  %v1944_v35 = vld [vmem:[%s2978_s2 + $0x30] sm:$0xff]  ;;  %v1945_v36 = vld [vmem:[%s2978_s2 + $0x38] sm:$0xff]  ;;  %vm612_vm9 = vcmask 57344  }
  0x6a   : > { %s433_s23 = scalar_lea.vmem %s2977_s1, %s432_s14  ;;  %2108 = vmatpush3.bf16.msk.msra.mxu1 %vm2684_vm4, %v2106_v11  ;;  %v899_v28 = vld [vmem:[%s2982_s6] sm:$0xf]  ;;  %v2113_v37 = vpack.c.bf16 %v1945_v36, %v1944_v35  ;;  %v1947_v38 = vld [vmem:[%s2979_s3 + $0x10] sm:$0xff]  ;;  %v1948_v39 = vld [vmem:[%s2979_s3 + $0x18] sm:$0x1]  ;;  %s2421_s26 = smov 127  }
  0x6b   : > { %v2670_v8 = vld [vmem:[%s433_s23] sm:$0x1]  ;;  %2033 = vmatprep.subr.mxu1 %v2415_v6  ;;  %v2116_v40 = vpack.c.bf16 %v1948_v39, %v1947_v38  ;;  %v1076_v48 = vld [vmem:[%s2980_s4 + $0x1] sm:$0x1]  ;;  %v1951_v59 = vld [vmem:[%s2981_s5 + $0x4] sm:$0xf] }
  0x6c   : > { %2104 = vmatpush3.bf16.msra.mxu0 %v2103_v7  ;;  %v1954_v60 = vld [vmem:[%s2982_s6 + $0x4] sm:$0xf]  ;;  %v1958_v63 = vld [vmem:[%s2978_s2 + $0x48] sm:$0xff]  ;;  %v1959_v4 = vld [vmem:[%s2978_s2 + $0x50] sm:$0xff]  ;;  %s2422_s21 = smov 1   ;;  %s2423_s23 = smov 2  }
  0x6d   : > { %2038 = vmatprep.subr.mxu0 %v2415_v6  ;;  %v1957_v62 = vld [vmem:[%s2978_s2 + $0x40] sm:$0xff]  ;;  %v1960_v5 = vld [vmem:[%s2978_s2 + $0x58] sm:$0xff]  ;;  %s2424_s7 = smov 126   ;;  %s620_s8 = sld [smem:[#allocation8]] }
  0x6e   : > { %v2120_v1 = vpack.c.bf16 %v1958_v63, %v1957_v62  ;;  %v2123_v7 = vpack.c.bf16 %v1960_v5, %v1959_v4  ;;  %v1962_v9 = vld [vmem:[%s2979_s3 + $0x20] sm:$0xff]  ;;  %v449_v36 = vld [vmem:[%s2631_s13 + $0x50] sm:$0xff]  ;;  %v464_v5 = vld [vmem:[%s2631_s13 + $0xc8] sm:$0xff]  ;;  %s1933_s24 = sld [smem:[#allocation8 + $0x1]]  ;;  %s1934_s29 = sld [smem:[#allocation8 + $0x2]] }
  0x6f   : > { %2024 = vmatmul.mubr.msk.f32.vlgmr.msra.gmra.mrb[0].mxu0 %vm651_vm1, %v2670_v8  ;;  %v439_v12 = vld [vmem:[%s2631_s13] sm:$0xff]  ;;  %v446_v30 = vld [vmem:[%s2631_s13 + $0x38] sm:$0xff]  ;;  %v461_v62 = vld [vmem:[%s2631_s13 + $0xb0] sm:$0xff]  ;;  %s2425_s27 = smov 3   ;;  %s2426_s28 = smov 125  }
  0x70   : > { %2040 = vmatprep.mubr.msk.f32.mxu0 %vm2414_vm0, %v2415_v6  ;;  %2039 = vmatpush3.msk.msra.mxu0 %vm825_vm7, %v899_v28  ;;  %v445_v28 = vld [vmem:[%s2631_s13 + $0x30] sm:$0xff]  ;;  %v450_v38 = vld [vmem:[%s2631_s13 + $0x58] sm:$0xff]  ;;  %s1972_s22 = sld [smem:[#allocation9 + $0x1]]  ;;  %s1715_s12 = sld [smem:[#allocation3]] }
  0x71   : > { %2115 = vmatprep.subr.bf16.mxu0 %v2413_v3  ;;  %s1973_s14 = sld [smem:[#allocation9 + $0x2]] }
 0x142   : > { %v721_v13 = vpop.f32.mrb[0].mxu0 }
 0x143   : > { %v725_v14 = vmax.f32 %v721_v13, 0.0  ;;  %v2025_v15 = vpop.f32.mrb[1].mxu0 }
 0x145   : > { %2031 = vmatmul.mubr.msk.f32.vlgmr.msra.gmra.mrb[0].mxu1 %vm729_vm5, %v725_v14 }
 0x146   : > { %2035 = vmatprep.mubr.msk.f32.mxu1 %vm2414_vm0, %v2415_v6  ;;  %2034 = vmatpush3.msk.msra.mxu1 %vm825_vm7, %v820_v27 }
 0x147   : > { %2109 = vmatprep.subr.bf16.mxu1 %v2413_v3 }
 0x218   : > { %v803_v17 = vpop.f32.mrb[0].mxu1 }
 0x219   : > { %v804_v18 = vadd.f32 %v803_v17, %v728_v16  ;;  %v2032_v19 = vpop.f32.mrb[1].mxu1 }
 0x21a   : > { %v2417_v19 = vmov 0  }
 0x21b   : > { %v807_v20 = vmul.f32 0.029411765, %v804_v18  ;;  %v440_v18 = vld [vmem:[%s2631_s13 + $0x8] sm:$0xff]  ;;  %2227 = vset.pattern.permute.xlu0 %v2417_v19  ;;  %2226 = vset.pattern.permute.xlu1 %v2417_v19 }
 0x21d   : > { %v809_v21 = vsel %vm808_vm6, %v807_v20, -inf }
 0x21e   : > { %810 = vmax.xlane.f32.xlu0 %v809_v21  ;;  %v441_v21 = vld [vmem:[%s2631_s13 + $0x10] sm:$0xff] }
 0x2ab   : > { %v811_v22 = vpop.xlane.xlu0 %810 }
 0x2ac   : > { %v812_v23 = vsub.f32 %v807_v20, %v811_v22  ;;  %v472_v20 = vadd.f32 %v440_v18, %v439_v12  ;;  %v469_v18 = vld [vmem:[%s2631_s13 + $0xf0] sm:$0xff] }
 0x2ae   : > { %v813_v24 = vmul.f32 1.442695, %v812_v23  ;;  %v473_v22 = vadd.f32 %v472_v20, %v441_v21  ;;  %v442_v23 = vld [vmem:[%s2631_s13 + $0x18] sm:$0xff] }
 0x2b0   : > { %2236 = vpow2.f32 %v813_v24  ;;  %v474_v24 = vadd.f32 %v473_v22, %v442_v23 }
 0x2ba   : > { %v2237_v25 = vpop.eup %2236 }
 0x2bb   : > { %v815_v26 = vsel %vm808_vm6, %v2237_v25, 0.0 }
 0x2bc   : > { %816 = vadd.xlane.f32.xlu0 %v815_v26  ;;  %v444_v26 = vld [vmem:[%s2631_s13 + $0x28] sm:$0xff] }
 0x349   : > { %v817_v29 = vpop.xlane.xlu0 %816 }
 0x34a   : > { %2238 = vrcp.f32 %v817_v29 }
 0x354   : > { %v2239_v32 = vpop.eup %2238 }
 0x355   : > { %v819_v34 = vmul.f32 %v2239_v32, %v2237_v25  ;;  %v443_v25 = vld [vmem:[%s2631_s13 + $0x20] sm:$0xff] }
 0x356   : > { %v447_v32 = vld [vmem:[%s2631_s13 + $0x40] sm:$0xff] }
 0x357   : > { %2036 = vmatmul.mubr.msk.f32.vlgmr.msra.gmra.mrb[2].mxu1 %vm821_vm8, %v819_v34  ;;  %2041 = vmatmul.mubr.msk.f32.vlgmr.msra.gmra.mrb[2].mxu0 %vm821_vm8, %v819_v34  ;;  %v448_v34 = vld [vmem:[%s2631_s13 + $0x48] sm:$0xff] }
 0x358   : > { %2111 = vmatpush3.bf16.msra.mxu1 %v2110_v33  ;;  %2051 = vmatprep.mubr.msk.f32.mxu1 %vm2414_vm0, %v2415_v6 }
 0x359   : > { %2112 = vmatprep.subr.bf16.mxu1 %v2413_v3  ;;  %2058 = vmatprep.mubr.msk.f32.mxu0 %vm2414_vm0, %v2415_v6 }
 0x35a   : > { %2118 = vmatpush3.bf16.msk.msra.mxu0 %vm2684_vm4, %v2116_v40  ;;  %v451_v40 = vld [vmem:[%s2631_s13 + $0x60] sm:$0xff] }
 0x35b   : > { %2061 = vmatprep.subr.mxu0 %v2415_v6 }
 0x35c   : > { %2114 = vmatpush3.bf16.msra.mxu1 %v2113_v37 }
 0x35d   : > { %2066 = vmatprep.subr.mxu1 %v2415_v6 }
 0x35f   : > { %2052 = vmatmul.mubr.msk.f32.vlgmr.msra.gmra.mrb[4].mxu1 %vm651_vm1, %v2670_v8 }
 0x360   : > { %2068 = vmatprep.mubr.msk.f32.mxu1 %vm2414_vm0, %v2415_v6  ;;  %2067 = vmatpush3.msk.msra.mxu1 %vm825_vm7, %v1954_v60  ;;  %v460_v60 = vld [vmem:[%s2631_s13 + $0xa8] sm:$0xff] }
 0x361   : > { %2125 = vmatprep.subr.bf16.mxu1 %v2413_v3 }
 0x42a   : > { %v2742_v41 = vpop.f32.mrb[2].mxu1  ;;  %v2744_v42 = vpop.f32.mrb[2].mxu0 }
 0x42b   : > { %v2037_v43 = vpop.f32.mrb[3].mxu1  ;;  %v2042_v44 = vpop.f32.mrb[3].mxu0 }
 0x42c   : > { %v452_v44 = vld [vmem:[%s2631_s13 + $0x68] sm:$0xff] }
 0x432   : > { %v1068_v45 = vpop.f32.mrb[4].mxu1 }
 0x433   : > { %v1072_v46 = vmax.f32 %v1068_v45, 0.0  ;;  %v2053_v47 = vpop.f32.mrb[5].mxu1 }
 0x435   : > { %2059 = vmatmul.mubr.msk.f32.vlgmr.msra.gmra.mrb[4].mxu0 %vm729_vm5, %v1072_v46  ;;  %v453_v46 = vld [vmem:[%s2631_s13 + $0x70] sm:$0xff] }
 0x436   : > { %2063 = vmatprep.mubr.msk.f32.mxu0 %vm2414_vm0, %v2415_v6  ;;  %2062 = vmatpush3.msk.msra.mxu0 %vm825_vm7, %v1951_v59 }
 0x437   : > { %2119 = vmatprep.subr.bf16.mxu0 %v2413_v3 }
 0x508   : > { %v1149_v49 = vpop.f32.mrb[4].mxu0 }
 0x509   : > { %v1150_v50 = vadd.f32 %v1149_v49, %v1076_v48  ;;  %v2060_v51 = vpop.f32.mrb[5].mxu0  ;;  %v454_v48 = vld [vmem:[%s2631_s13 + $0x78] sm:$0xff] }
 0x50b   : > { %v1153_v52 = vmul.f32 0.029411765, %v1150_v50  ;;  %v455_v50 = vld [vmem:[%s2631_s13 + $0x80] sm:$0xff] }
 0x50d   : > { %v1154_v53 = vsel %vm808_vm6, %v1153_v52, -inf }
 0x50e   : > { %1155 = vmax.xlane.f32.xlu1 %v1154_v53 }
 0x59b   : > { %v1156_v54 = vpop.xlane.xlu1 %1155 }
 0x59c   : > { %v1157_v55 = vsub.f32 %v1153_v52, %v1156_v54  ;;  %v456_v52 = vld [vmem:[%s2631_s13 + $0x88] sm:$0xff]  ;;  %v457_v54 = vld [vmem:[%s2631_s13 + $0x90] sm:$0xff] }
 0x59e   : > { %v1158_v56 = vmul.f32 1.442695, %v1157_v55 }
 0x5a0   : > { %2240 = vpow2.f32 %v1158_v56  ;;  %v458_v56 = vld [vmem:[%s2631_s13 + $0x98] sm:$0xff] }
 0x5aa   : > { %v2241_v57 = vpop.eup %2240 }
 0x5ab   : > { %v1160_v58 = vsel %vm808_vm6, %v2241_v57, 0.0 }
 0x5ac   : > { %1161 = vadd.xlane.f32.xlu1 %v1160_v58  ;;  %v459_v58 = vld [vmem:[%s2631_s13 + $0xa0] sm:$0xff] }
 0x639   : > { %v1162_v61 = vpop.xlane.xlu1 %1161 }
 0x63a   : > { %2242 = vrcp.f32 %v1162_v61 }
 0x644   : > { %v2243_v0 = vpop.eup %2242 }
 0x645   : > { %v1164_v2 = vmul.f32 %v2243_v0, %v2241_v57  ;;  %v462_v0 = vld [vmem:[%s2631_s13 + $0xb8] sm:$0xff] }
 0x647   : > { %2064 = vmatmul.mubr.msk.f32.vlgmr.msra.gmra.mrb[6].mxu0 %vm821_vm8, %v1164_v2  ;;  %2069 = vmatmul.mubr.msk.f32.vlgmr.msra.gmra.mrb[6].mxu1 %vm821_vm8, %v1164_v2  ;;  %v463_v2 = vld [vmem:[%s2631_s13 + $0xc0] sm:$0xff] }
 0x648   : > { %2121 = vmatpush3.bf16.msra.mxu0 %v2120_v1  ;;  %2079 = vmatprep.mubr.msk.f32.mxu0 %vm2414_vm0, %v2415_v6 }
 0x649   : > { %2122 = vmatprep.subr.bf16.mxu0 %v2413_v3  ;;  %2086 = vmatprep.mubr.msk.f32.mxu1 %vm2414_vm0, %v2415_v6  ;;  %v1963_v3 = vld [vmem:[%s2979_s3 + $0x28] sm:$0x1] }
 0x64a   : > { %v2126_v10 = vpack.c.bf16 %v1963_v3, %v1962_v9  ;;  %v465_v9 = vld [vmem:[%s2631_s13 + $0xd0] sm:$0xff] }
 0x64c   : > { %2124 = vmatpush3.bf16.msra.mxu0 %v2123_v7  ;;  %2128 = vmatpush3.bf16.msk.msra.mxu1 %vm2684_vm4, %v2126_v10  ;;  %v466_v10 = vld [vmem:[%s2631_s13 + $0xd8] sm:$0xff] }
 0x64d   : > { %2094 = vmatprep.subr.mxu0 %v2415_v6  ;;  %2089 = vmatprep.subr.mxu1 %v2415_v6 }
 0x64f   : > { %2080 = vmatmul.mubr.msk.f32.vlgmr.msra.gmra.mrb[8].mxu0 %vm651_vm1, %v2670_v8 }
 0x650   : > { %2096 = vmatprep.mubr.msk.f32.mxu0 %vm2414_vm0, %v2415_v6 }
 0x71a   : > { %v2797_v8 = vpop.f32.mrb[6].mxu0  ;;  %v2799_v11 = vpop.f32.mrb[6].mxu1 }
 0x71b   : > { %v2065_v13 = vpop.f32.mrb[7].mxu0  ;;  %v2070_v14 = vpop.f32.mrb[7].mxu1 }
 0x71c   : > { %v467_v14 = vld [vmem:[%s2631_s13 + $0xe0] sm:$0xff] }
 0x722   : > { %v1427_v15 = vpop.f32.mrb[8].mxu0 }
 0x723   : > { %v1431_v16 = vmax.f32 %v1427_v15, 0.0  ;;  %v2081_v17 = vpop.f32.mrb[9].mxu0 }
 0x724   : > { %v1435_v17 = vld [vmem:[%s2980_s4 + $0x2] sm:$0x1] }
 0x725   : > { %2087 = vmatmul.mubr.msk.f32.vlgmr.msra.gmra.mrb[8].mxu1 %vm729_vm5, %v1431_v16  ;;  %v468_v16 = vld [vmem:[%s2631_s13 + $0xe8] sm:$0xff] }
 0x726   : > { %2091 = vmatprep.mubr.msk.f32.mxu1 %vm2414_vm0, %v2415_v6  ;;  %v475_v6 = vadd.f32 %v474_v24, %v443_v25  ;;  %v470_v25 = vld [vmem:[%s2631_s13 + $0xf8] sm:$0xff]  ;;  %s1730_s13 = sld [smem:[#allocation9]] }
 0x728   : > { %v476_v27 = vadd.f32 %v475_v6, %v444_v26 }
 0x72a   : > { %v477_v29 = vadd.f32 %v476_v27, %v445_v28  ;;  %v2418_v27 = vmov 2   ;;  %v506_v28 = vlaneseq }
 0x72c   : > { %v478_v31 = vadd.f32 %v477_v29, %v446_v30  ;;  %v2844_v30 = vshrl.u32 %v506_v28, 7 }
 0x72e   : > { %v479_v33 = vadd.f32 %v478_v31, %v447_v32 }
 0x730   : > { %v480_v35 = vadd.f32 %v479_v33, %v448_v34  ;;  %v508_v33 = vsub.s32 0, %v2844_v30  ;;  %v2419_v34 = vmov 1966171168  }
 0x732   : > { %v481_v37 = vadd.f32 %v480_v35, %v449_v36  ;;  %v543_v35 = vunpack.c.l.s4 %v2419_v34  ;;  %v512_v36 = vsub.s32 1, %v2844_v30 }
 0x734   : > { %v482_v39 = vadd.f32 %v481_v37, %v450_v38  ;;  %v516_v37 = vsub.s32 2, %v2844_v30  ;;  %v520_v38 = vsub.s32 3, %v2844_v30 }
 0x736   : > { %v483_v43 = vadd.f32 %v482_v39, %v451_v40  ;;  %v524_v39 = vsub.s32 4, %v2844_v30  ;;  %v528_v40 = vsub.s32 5, %v2844_v30 }
 0x738   : > { %v484_v45 = vadd.f32 %v483_v43, %v452_v44  ;;  %v532_v43 = vsub.s32 6, %v2844_v30  ;;  %v536_v44 = vsub.s32 7, %v2844_v30 }
 0x73a   : > { %v485_v47 = vadd.f32 %v484_v45, %v453_v46  ;;  %v544_v46 = vunpack.c.0.s8 %v543_v35 }
 0x73c   : > { %v486_v49 = vadd.f32 %v485_v47, %v454_v48 }
 0x73e   : > { %v487_v51 = vadd.f32 %v486_v49, %v455_v50 }
 0x740   : > { %v488_v53 = vadd.f32 %v487_v51, %v456_v52 }
 0x742   : > { %v489_v55 = vadd.f32 %v488_v53, %v457_v54 }
 0x744   : > { %v490_v57 = vadd.f32 %v489_v55, %v458_v56  ;;  %v547_v55 = vsub.s32 %v544_v46, %v2844_v30 }
 0x746   : > { %v491_v59 = vadd.f32 %v490_v57, %v459_v58 }
 0x748   : > { %v492_v61 = vadd.f32 %v491_v59, %v460_v60 }
 0x74a   : > { %v493_v63 = vadd.f32 %v492_v61, %v461_v62 }
 0x74c   : > { %v494_v1 = vadd.f32 %v493_v63, %v462_v0 }
 0x74e   : > { %v495_v4 = vadd.f32 %v494_v1, %v463_v2 }
 0x750   : > { %v496_v7 = vadd.f32 %v495_v4, %v464_v5 }
 0x752   : > { %v497_v3 = vadd.f32 %v496_v7, %v465_v9 }
 0x754   : > { %v498_v13 = vadd.f32 %v497_v3, %v466_v10  ;;  %v2420_v3 = vmov 1   ;;  %v1966_v10 = vld [vmem:[%s2981_s5 + $0x8] sm:$0xf] }
 0x755   : > { %2090 = vmatpush3.msk.msra.mxu1 %vm825_vm7, %v1966_v10 }
 0x756   : > { %v499_v15 = vadd.f32 %v498_v13, %v467_v14  ;;  %v1969_v13 = vld [vmem:[%s2982_s6 + $0x8] sm:$0xf] }
 0x757   : > { %2095 = vmatpush3.msk.msra.mxu0 %vm825_vm7, %v1969_v13 }
 0x758   : > { %v500_v12 = vadd.f32 %v499_v15, %v468_v16 }
 0x75a   : > { %v501_v23 = vadd.f32 %v500_v12, %v469_v18 }
 0x75c   : > { %v502_v26 = vadd.f32 %v501_v23, %v470_v25 }
 0x7f8   : > { %v1508_v20 = vpop.f32.mrb[8].mxu1 }
 0x7f9   : > { %v1509_v21 = vadd.f32 %v1508_v20, %v1435_v17  ;;  %v2088_v22 = vpop.f32.mrb[9].mxu1 }
 0x7fb   : > { %v1512_v24 = vmul.f32 0.029411765, %v1509_v21 }
 0x7fd   : > { %v1513_v6 = vsel %vm808_vm6, %v1512_v24, -inf }
 0x7fe   : > { %1514 = vmax.xlane.f32.xlu0 %v1513_v6 }
 0x802   : > { %503 = vadd.xlane.f32.xlu0 %v502_v26 }
 0x818   : > { %975 = vperm.xlu0 %2227, %v2742_v41  }
 0x81c   : > { %2233 = vset.pattern.permute.xlu0 %v2418_v27 }
 0x81d   : > { %1351 = vperm.xlu0 %2233, %v2797_v8  }
 0x88b   : > { %v1515_v29 = vpop.xlane.xlu0 %1514 }
 0x88c   : > { %v1516_v31 = vsub.f32 %v1512_v24, %v1515_v29 }
 0x88e   : > { %v1517_v32 = vmul.f32 1.442695, %v1516_v31 }
 0x88f   : > { %v504_v45 = vpop.xlane.xlu0 %503 }
 0x890   : > { %2244 = vpow2.f32 %v1517_v32  ;;  %v509_v47 = vrot.slane %v504_v45, %v508_v33  ;;  %v513_v48 = vrot.slane %v504_v45, %v512_v36  ;;  %v517_v49 = vrot.slane %v504_v45, %v516_v37 }
 0x891   : > { %v521_v50 = vrot.slane %v504_v45, %v520_v38  ;;  %v525_v51 = vrot.slane %v504_v45, %v524_v39  ;;  %v529_v52 = vrot.slane %v504_v45, %v528_v40  ;;  %v533_v53 = vrot.slane %v504_v45, %v532_v43 }
 0x892   : > { %v537_v54 = vrot.slane %v504_v45, %v536_v44  ;;  %v538_v56 = vcombine.low %v509_v47, %v513_v48  ;;  %v628_v36 = vstv %s620_s8  ;;  %v632_v37 = vstv %s1933_s24 }
 0x893   : > { %v539_v57 = vcombine.low %v517_v49, %v521_v50  ;;  %v540_v58 = vcombine.low %v525_v51, %v529_v52  ;;  %v643_v44 = vstv %s1934_s29 }
 0x894   : > { %v541_v59 = vcombine.low %v533_v53, %v537_v54  ;;  %v548_v62 = vrot.slane %v538_v56, %v547_v55 }
 0x895   : > { %v555_v63 = vrot.slane %v539_v57, %v547_v55  ;;  %v562_v0 = vrot.slane %v540_v58, %v547_v55 }
 0x896   : > { %v569_v1 = vrot.slane %v541_v59, %v547_v55 }
 0x897   : > { %v570_v2 = vcombine.low %v548_v62, %v555_v63  ;;  %v976_v31 = vpop.permute.xlu0 %975 }
 0x898   : > { %v571_v4 = vcombine.low %v562_v0, %v569_v1 }
 0x899   : > { %v578_v5 = vrot.slane %v570_v2, %v547_v55 }
 0x89a   : > { %v2245_v60 = vpop.eup %2244  ;;  %v585_v7 = vrot.slane %v571_v4, %v547_v55 }
 0x89b   : > { %v1519_v61 = vsel %vm808_vm6, %v2245_v60, 0.0 }
 0x89c   : > { %1520 = vadd.xlane.f32.xlu1 %v1519_v61  ;;  %v586_v9 = vcombine.low %v578_v5, %v585_v7  ;;  %v1352_v33 = vpop.permute.xlu0 %1351 }
 0x8ad   : > { %588 = vperm.xlu1 %2226, %v586_v9  }
 0x8b1   : > { %981 = vperm.xlu1 %2226, %v2744_v42   ;;  %v2873_v42 = vand.u32 127, %v506_v28 }
 0x8b3   : > { %v594_v15 = vsub.s32 %v2873_v42, %v2844_v30  ;;  %v623_v30 = vadd.s32 4294967295, %v2873_v42  ;;  %v638_v35 = vadd.s32 1, %v2873_v42  ;;  %vm619_vm14 = vcmp.lt.s32.totalorder %v2873_v42, 8 }
 0x8b4   : > { %v1320_v59 = vadd.s32 4294967294, %v2873_v42  ;;  %v1345_v63 = vadd.s32 2, %v2873_v42  ;;  %v1679_v9 = vadd.s32 4294967293, %v2873_v42 }
 0x8b5   : > { %2228 = vset.pattern.permute.xlu1 %v2420_v3  ;;  %vm624_vm10 = vcmp.ge.s32.totalorder %v623_v30, 0  ;;  %vm625_vm11 = vcmp.lt.s32.totalorder %v623_v30, 8  ;;  %vm640_vm13 = vcmp.lt.s32.totalorder %v638_v35, 8 }
 0x8b6   : > { %986 = vperm.xlu1 %2228, %v2742_v41   ;;  %vm626_vm12 = vmand %vm624_vm10, %vm625_vm11  ;;  %vm1321_vm15 = vcmp.ge.s32.totalorder %v1320_v59, 0  ;;  %vm1322_vm0 = vcmp.lt.s32.totalorder %v1320_v59, 8  ;;  %vm1347_vm3 = vcmp.lt.s32.totalorder %v1345_v63, 8  ;;  %vm1680_vm4 = vcmp.ge.s32.totalorder %v1679_v9, 0 }
 0x8b7   : > { %vm1323_vm1 = vmand %vm1321_vm15, %vm1322_vm0  ;;  %vm1681_vm5 = vcmp.lt.s32.totalorder %v1679_v9, 8 }
 0x8b8   : > { %vm1682_vm6 = vmand %vm1680_vm4, %vm1681_vm5 }
 0x8ba   : > { %2229 = vset.pattern.permute.xlu1 %v2417_v19 }
 0x8bb   : > { %1327 = vperm.xlu1 %2229, %v2797_v8  }
 0x8bf   : > { %2230 = vset.pattern.permute.xlu1 %v2418_v27 }
 0x8c0   : > { %992 = vperm.xlu1 %2230, %v2742_v41   ;;  %v471_v41 = vld [vmem:[#allocation2] sm:$0x1] }
 0x8c4   : > { %2231 = vset.pattern.permute.xlu1 %v2417_v19 }
 0x8c5   : > { %1333 = vperm.xlu1 %2231, %v2799_v11  }
 0x8c9   : > { %2232 = vset.pattern.permute.xlu1 %v2420_v3 }
 0x8ca   : > { %1338 = vperm.xlu1 %2232, %v2797_v8  }
 0x8ce   : > { %2234 = vset.pattern.permute.xlu1 %v2417_v19 }
 0x929   : > { %v1521_v14 = vpop.xlane.xlu1 %1520 }
 0x92a   : > { %2246 = vrcp.f32 %v1521_v14 }
 0x92d   : > { %v589_v16 = vpop.permute.xlu1 %588 }
 0x92e   : > { %v595_v17 = vrot.slane %v589_v16, %v594_v15 }
 0x930   : > { %v602_v12 = vrot.slane %v595_v17, %v547_v55 }
 0x931   : > { %v982_v22 = vpop.permute.xlu1 %981 }
 0x932   : > { %v609_v18 = vrot.slane %v602_v12, %v547_v55  ;;  %v1704_v12 = vadd.s32 3, %v2873_v42 }
 0x934   : > { %v2247_v20 = vpop.eup %2246  ;;  %v611_v11 = vadd.f32 %v609_v18, %v471_v41  ;;  %vm1706_vm7 = vcmp.lt.s32.totalorder %v1704_v12, 8 }
 0x935   : > { %v1523_v21 = vmul.f32 %v2247_v20, %v2245_v60  ;;  %v987_v23 = vpop.permute.xlu1 %986 }
 0x936   : > { %613 = vst.msk [vmem:[#allocation2] sm:$0x1] %vm612_vm9, %v611_v11 }
 0x937   : > { %2092 = vmatmul.mubr.msk.f32.vlgmr.msra.gmra.mrb[10].mxu1 %vm821_vm8, %v1523_v21  ;;  %2097 = vmatmul.mubr.msk.f32.vlgmr.msra.gmra.mrb[10].mxu0 %vm821_vm8, %v1523_v21 }
 0x93a   : > { %v1328_v24 = vpop.permute.xlu1 %1327 }
 0x93d   : > { %v617_v8 = vld [vmem:[#allocation2] sm:$0x1] }
 0x93e   : > { %v2879_v19 = vmul.f32 0.00024414063, %v617_v8 }
 0x93f   : > { %v993_v25 = vpop.permute.xlu1 %992 }
 0x940   : > { %636 = vrot.lane.b32.xlu0 %v2879_v19, %s2421_s26  ;;  %621 = vrot.lane.b32.xlu1 %v2879_v19, %s2422_s21  ;;  %v633_v39 = vmul.f32 %v632_v37, %v2879_v19  ;;  %v989_v53 = vmul.f32 %v987_v23, %v2879_v19  ;;  %s1974_s26 = sld [smem:[#allocation9 + $0x3]]  ;;  %s1975_s21 = sshll.u32 %s2400_s18, 4 }
 0x941   : > { %s2927_s29 = scalar_lea.hbm %s2986_s10, %s1975_s21  ;;  %s2427_s18 = smov [#allocation11]  }
 0x944   : > { %1318 = vrot.lane.b32.xlu1 %v2879_v19, %s2423_s23  ;;  %v1334_v29 = vpop.permute.xlu1 %1333  ;;  %s429_s23 = scalar_lea.vmem [#allocation11], %s2627_s11 }
 0x946   : > { %v1791_v12 = vstv %s1974_s26 }
 0x949   : > { %v1339_v32 = vpop.permute.xlu1 %1338 }
 0x94a   : > { %v1341_v4 = vmul.f32 %v1339_v32, %v2879_v19 }
 0x9b2   : > { %v622_v34 = vpop.permute.xlu1 %621  ;;  %v637_v43 = vpop.permute.xlu0 %636 }
 0x9b3   : > { %v627_v38 = vsel %vm626_vm12, %v622_v34, 0.0  ;;  %v642_v45 = vsel %vm640_vm13, %v637_v43, 0.0 }
 0x9b4   : > { %v629_v40 = vmul.f32 %v628_v36, %v627_v38  ;;  %v644_v47 = vmul.f32 %v643_v44, %v642_v45  ;;  %v978_v50 = vmul.f32 %v976_v31, %v627_v38  ;;  %v995_v55 = vmul.f32 %v993_v25, %v642_v45 }
 0x9b6   : > { %v634_v46 = vadd.f32 %v633_v39, %v629_v40  ;;  %v984_v52 = vadd.f32 %v982_v22, %v978_v50  ;;  %v1319_v60 = vpop.permute.xlu1 %1318 }
 0x9b7   : > { %v1324_v61 = vsel %vm1323_vm1, %v1319_v60, 0.0 }
 0x9b8   : > { %v645_v48 = vadd.f32 %v644_v47, %v634_v46  ;;  %v990_v54 = vadd.f32 %v989_v53, %v984_v52  ;;  %v1330_v62 = vmul.f32 %v1328_v24, %v1324_v61 }
 0x9ba   : > { %v1718_v49 = vsel %vm619_vm14, %v645_v48, 0.0  ;;  %v996_v56 = vadd.f32 %v995_v55, %v990_v54  ;;  %v1336_v2 = vadd.f32 %v1334_v29, %v1330_v62 }
 0x9bb   : > { %v1719_v51 = vsel %vm733_vm2, %v1718_v49, 0.0 }
 0x9bc   : > { %v1737_v57 = vsel %vm619_vm14, %v996_v56, 0.0  ;;  %v1342_v13 = vadd.f32 %v1341_v4, %v1336_v2  ;;  %v1734_v4 = vstv %s1730_s13  ;;  %s2322_s13 = sshll.u32 %s2427_s18, 4  ;;  %s2323_s13 = int_to_ptr.vmem [resolvable:$false] %s2322_s13 }
 0x9bd   : > { %v1738_v58 = vsel %vm733_vm2, %v1737_v57, 0.0 }
 0xa0a   : > { %v1598_v6 = vpop.f32.mrb[10].mxu1  ;;  %v1673_v26 = vpop.f32.mrb[10].mxu0 }
 0xa0b   : > { %1710 = vperm.xlu0 %2233, %v1598_v6   ;;  %1686 = vperm.xlu1 %2234, %v1598_v6   ;;  %v2093_v27 = vpop.f32.mrb[11].mxu1  ;;  %v2098_v28 = vpop.f32.mrb[11].mxu0 }
 0xa0f   : > { %1343 = vrot.lane.b32.xlu0 %v2879_v19, %s2424_s7  ;;  %1692 = vperm.xlu1 %2234, %v1673_v26   ;;  %s1812_s7 = sshll.u32 %s429_s23, 4  ;;  %s2929_s7 = int_to_ptr.vmem [resolvable:$true] %s1812_s7 }
 0xa10   : > { %p2325_p3 = scmp.lt.s32.totalorder %s2929_s7, %s2323_s13 }
 0xa13   : > { %2235 = vset.pattern.permute.xlu1 %v2420_v3 }
 0xa14   : > { %1697 = vperm.xlu1 %2235, %v1598_v6  }
 0xa18   : > { %1677 = vrot.lane.b32.xlu1 %v2879_v19, %s2425_s27  ;;  %s1800_s27 = scalar_lea.sflag [#allocation6], %s2627_s11 }
 0xa1c   : > { %1702 = vrot.lane.b32.xlu1 %v2879_v19, %s2426_s28  ;;  %s2318_s28 = scalar_lea.vmem %s2929_s7, 16 }
 0xa1d   : > { %p2319_p6 = scmp.ne.s32.totalorder %s2929_s7, %s2318_s28 }
 0xa1f   : > { %p2320_p8 = pnand %p2319_p6, %p2575_p13 }
 0xa21   : > { %p2321_p9 = pneg %p2320_p8 }
 0xa2e   : > { %1720 = vadd.xlane.f32.xlu0 %v1719_v51 }
 0xa40   : > { %1739 = vadd.xlane.f32.xlu1 %v1738_v58 }
 0xa8a   : > { %v1711_v0 = vpop.permute.xlu0 %1710  ;;  %v1687_v1 = vpop.permute.xlu1 %1686 }
 0xa8e   : > { %v1344_v5 = vpop.permute.xlu0 %1343  ;;  %v1693_v7 = vpop.permute.xlu1 %1692 }
 0xa8f   : > { %v1349_v3 = vsel %vm1347_vm3, %v1344_v5, 0.0 }
 0xa90   : > { %v1354_v10 = vmul.f32 %v1352_v33, %v1349_v3 }
 0xa92   : > { %v1355_v14 = vadd.f32 %v1354_v10, %v1342_v13  ;;  %v1716_v10 = vstv %s1715_s12  ;;  %v1772_v13 = vstv %s1973_s14 }
 0xa93   : > { %v1698_v15 = vpop.permute.xlu1 %1697 }
 0xa94   : > { %v1756_v16 = vsel %vm619_vm14, %v1355_v14, 0.0  ;;  %v1700_v11 = vmul.f32 %v1698_v15, %v2879_v19 }
 0xa95   : > { %v1757_v17 = vsel %vm733_vm2, %v1756_v16, 0.0 }
 0xa96   : > { %1758 = vadd.xlane.f32.xlu0 %v1757_v17 }
 0xa97   : > { %v1678_v41 = vpop.permute.xlu1 %1677 }
 0xa98   : > { %v1683_v18 = vsel %vm1682_vm6, %v1678_v41, 0.0 }
 0xa99   : > { %v1689_v20 = vmul.f32 %v1687_v1, %v1683_v18 }
 0xa9b   : > { %v1695_v21 = vadd.f32 %v1693_v7, %v1689_v20  ;;  %v1703_v8 = vpop.permute.xlu1 %1702  ;;  %v1753_v7 = vstv %s1972_s22  ;;  %s2324_s22 = scalar_lea.vmem %s2323_s13, 32 }
 0xa9c   : > { %v1708_v22 = vsel %vm1706_vm7, %v1703_v8, 0.0  ;;  %p2326_p5 = scmp.lt.s32.totalorder %s2324_s22, %s2318_s28 }
 0xa9d   : > { %v1713_v23 = vmul.f32 %v1711_v0, %v1708_v22  ;;  %v1701_v24 = vadd.f32 %v1700_v11, %v1695_v21 }
 0xa9e   : > { %p2327_p10 = por %p2326_p5, %p2325_p3 }
 0xa9f   : > { %v1714_v25 = vadd.f32 %v1713_v23, %v1701_v24 }
 0xaa0   : > { %p2328_p0 = pnand %p2327_p10, %p2321_p9 }
 0xaa1   : > { %v1775_v6 = vsel %vm619_vm14, %v1714_v25, 0.0 }
 0xaa2   : > { %v1776_v26 = vsel %vm733_vm2, %v1775_v6, 0.0 }
 0xaa3   : > { %1777 = vadd.xlane.f32.xlu0 %v1776_v26 }
 0xabb   : > { %v1721_v27 = vpop.xlane.xlu0 %1720 }
 0xabc   : > { %v1722_v28 = vmul.f32 0.125, %v1721_v27 }
 0xabe   : > { %v1723_v29 = vsub.f32 %v645_v48, %v1722_v28 }
 0xac0   : > { %v1724_v30 = vmul.f32 %v1723_v29, %v1723_v29 }
 0xac2   : > { %v1725_v31 = vsel %vm619_vm14, %v1724_v30, 0.0 }
 0xac3   : > { %v1726_v19 = vsel %vm733_vm2, %v1725_v31, 0.0 }
 0xac4   : > { %1727 = vadd.xlane.f32.xlu1 %v1726_v19 }
 0xacd   : > { %v1740_v32 = vpop.xlane.xlu1 %1739 }
 0xace   : > { %v1741_v33 = vmul.f32 0.125, %v1740_v32 }
 0xad0   : > { %v1742_v34 = vsub.f32 %v996_v56, %v1741_v33 }
 0xad2   : > { %v1743_v35 = vmul.f32 %v1742_v34, %v1742_v34 }
 0xad4   : > { %v1744_v36 = vsel %vm619_vm14, %v1743_v35, 0.0 }
 0xad5   : > { %v1745_v37 = vsel %vm733_vm2, %v1744_v36, 0.0 }
 0xad6   : > { %1746 = vadd.xlane.f32.xlu0 %v1745_v37 }
 0xb23   : > { %v1759_v38 = vpop.xlane.xlu0 %1758 }
 0xb24   : > { %v1760_v39 = vmul.f32 0.125, %v1759_v38 }
 0xb26   : > { %v1761_v40 = vsub.f32 %v1355_v14, %v1760_v39 }
 0xb28   : > { %v1762_v43 = vmul.f32 %v1761_v40, %v1761_v40 }
 0xb2a   : > { %v1763_v44 = vsel %vm619_vm14, %v1762_v43, 0.0 }
 0xb2b   : > { %v1764_v45 = vsel %vm733_vm2, %v1763_v44, 0.0 }
 0xb2c   : > { %1765 = vadd.xlane.f32.xlu1 %v1764_v45 }
 0xb30   : > { %v1778_v46 = vpop.xlane.xlu0 %1777 }
 0xb31   : > { %v1779_v47 = vmul.f32 0.125, %v1778_v46 }
 0xb33   : > { %v1780_v48 = vsub.f32 %v1714_v25, %v1779_v47 }
 0xb35   : > { %v1781_v49 = vmul.f32 %v1780_v48, %v1780_v48 }
 0xb37   : > { %v1782_v50 = vsel %vm619_vm14, %v1781_v49, 0.0 }
 0xb38   : > { %v1783_v51 = vsel %vm733_vm2, %v1782_v50, 0.0 }
 0xb39   : > { %1784 = vadd.xlane.f32.xlu0 %v1783_v51 }
 0xb51   : > { %v1728_v52 = vpop.xlane.xlu1 %1727 }
 0xb52   : > { %v1729_v54 = vmul.f32 0.125, %v1728_v52 }
 0xb54   : > { %v1731_v57 = vadd.f32 1e-05, %v1729_v54 }
 0xb56   : > { %2248 = vrsqrt.f32 %v1731_v57 }
 0xb60   : > { %v2249_v62 = vpop.eup %2248 }
 0xb61   : > { %v1733_v1 = vmul.f32 %v2249_v62, %v1723_v29 }
 0xb63   : > { %v1747_v53 = vpop.xlane.xlu0 %1746  ;;  %v1735_v9 = vmul.f32 %v1734_v4, %v1733_v1 }
 0xb64   : > { %v1748_v55 = vmul.f32 0.125, %v1747_v53 }
 0xb65   : > { %v1736_v15 = vadd.f32 %v1735_v9, %v1716_v10 }
 0xb66   : > { %v1750_v59 = vadd.f32 1e-05, %v1748_v55 }
 0xb68   : > { %2250 = vrsqrt.f32 %v1750_v59 }
 0xb72   : > { %v2251_v0 = vpop.eup %2250 }
 0xb73   : > { %v1752_v5 = vmul.f32 %v2251_v0, %v1742_v34 }
 0xb75   : > { %v1754_v14 = vmul.f32 %v1753_v7, %v1752_v5 }
 0xb77   : > { %v1755_v18 = vadd.f32 %v1754_v14, %v1736_v15 }
 0xbb9   : > { %v1766_v56 = vpop.xlane.xlu1 %1765 }
 0xbba   : > { %v1767_v58 = vmul.f32 0.125, %v1766_v56 }
 0xbbc   : > { %v1769_v60 = vadd.f32 1e-05, %v1767_v58 }
 0xbbe   : > { %2252 = vrsqrt.f32 %v1769_v60 }
 0xbc6   : > { %v1785_v61 = vpop.xlane.xlu0 %1784 }
 0xbc7   : > { %v1786_v42 = vmul.f32 0.125, %v1785_v61 }
 0xbc8   : > { %v2253_v2 = vpop.eup %2252 }
 0xbc9   : > { %v1788_v63 = vadd.f32 1e-05, %v1786_v42  ;;  %v1771_v3 = vmul.f32 %v2253_v2, %v1761_v40 }
 0xbcb   : > { %2254 = vrsqrt.f32 %v1788_v63  ;;  %v1773_v16 = vmul.f32 %v1772_v13, %v1771_v3 }
 0xbcd   : > { %v1774_v20 = vadd.f32 %v1773_v16, %v1755_v18 }
 0xbd5   : > { %v2255_v17 = vpop.eup %2254 }
 0xbd6   : > { %v1790_v41 = vmul.f32 %v2255_v17, %v1780_v48 }
 0xbd8   : > { %v1792_v11 = vmul.f32 %v1791_v12, %v1790_v41 }
 0xbda   : > { %v1793_v21 = vadd.f32 %v1792_v11, %v1774_v20 }
 0xbdc   : > { %v1794_v8 = vmul.f32 0.5, %v1793_v21 }
 0xbde   : > { %2256 = vtanh.f32 %v1794_v8 }
 0xbe8   : > { %v2257_v22 = vpop.eup %2256 }
 0xbe9   : > { %v1796_v23 = vadd.f32 1.0, %v2257_v22 }
 0xbeb   : > { %v1797_v24 = vmul.f32 0.5, %v1796_v23 }
 0xbed   : > { %1798 = vst [vmem:[%s429_s23] sm:$0x1] %v1797_v24 }
 0xbee   : > { %2331 = shalt.err (!%p2328_p0)
}
 0xbef   : > { %s2332_s11 = scalar_lea.hbm %s2927_s29, 16  ;;  %s2336_s26 = scalar_lea.hbm %s2986_s10, 32 }
 0xbf0   : > { %p2333_p1 = scmp.ne.s32.totalorder %s2927_s29, %s2332_s11  ;;  %p2337_p7 = scmp.lt.u32.totalorder %s2927_s29, %s2986_s10 }
 0xbf1   : > { %p2338_p11 = scmp.lt.u32.totalorder %s2336_s26, %s2332_s11  ;;  %p2340_p6 = scmp.lt.u32.totalorder %s2332_s11, %s2927_s29 }
 0xbf2   : > { %p2334_p2 = pnand %p2333_p1, %p2575_p13 }
 0xbf3   : > { %p2339_p4 = por %p2338_p11, %p2337_p7 }
 0xbf4   : > { %p2335_p12 = pneg %p2334_p2 }
 0xbf5   : > { %p2341_p8 = por %p2340_p6, %p2339_p4 }
 0xbf7   : > { %p2342_p9 = pnand %p2341_p8, %p2335_p12 }
 0xbf9   : > { %2345 = shalt.err (!%p2342_p9)
}
 0xbfa   : > { %2139 = dma.vmem_to_hbm [thread:$0]  (%p2575_p13), %s2929_s7, 16, %s2927_s29, %s1800_s27  }
 0xbfb PF: > { %s1824_s8 = sand.u32 1, %s2388_s15   ;;  %p3011_p3 = scmp.ne.s32.totalorder %s2997_s25, 0 }
 0xbfc   : > { %p3012_p5 = scmp.ge.s32.totalorder %s2408_s20, 2  ;;  %s1825_s24 = scalar_lea.sflag [#allocation6], %s1824_s8 }
 0xbfe   : > { %p2153_p10 = pnand %p3012_p5, %p3011_p3 }
 0xc00   : > { %2383 = dma.done.wait (!%p2153_p10), %s1825_s24, 16  }
 0xc01   : > { %2385 = vsyncadd (!%p2153_p10), %s1825_s24, 4294967280  ;;  %s29_s20 = sadd.s32 1, %s2408_s20   ;;  %s3013_s30 = sld [smem:[#allocation16_spill]] }
 0xc02   : > { %p26_p0 = scmp.ge.s32.totalorder %s29_s20, 4   ;;  %s3014_s15 = smov %s2392_s16 }
 0xc03   : > { %s3015_s16 = smov %s2396_s17  ;;  %s3016_s17 = smov %s2584_s9 }
 0xc04   : > { %s3017_s18 = smov %s2404_s19  ;;  %28 = sbr.rel (!%p26_p0) target bundleno = 12 (0xc), region = 133 }
 0xc07   : > { %s3018_s19 = smov %s3013_s30 }
 0xc0b   :  { %1829 = vsyncpa [#allocation5], 1 }
 0xc0c   :  { %1831 = vsyncpa [#allocation5 + $0x1], 1 }
 0xc0d   :  { %1832 = vsyncpa [#allocation6], 1 }
 0xc0e   :  { %1834 = vsyncpa [#allocation6 + $0x1], 1 }
 0xc0f   :  { %1835 = vsyncpa [#allocation7], 1 }
 0xc10   :  { %1837 = vsyncpa [#allocation7 + $0x1], 1 }
 0xc11   :  { %1838 = vsyncpa [#allocation10], 1 }

</bundles_post_ra>
